<compile_context>
chip_gen: v5e
topology: v5e:2x2
jax: 0.10.0
libtpu: 0.0.40
codegen_flags: <defaults>
</compile_context>

<pallas_src>
import functools

import jax
import jax.numpy as jnp
from jax.experimental import pallas as pl
from jax.experimental.pallas import tpu as pltpu

EPS = 1e-5
H1, H2, H3 = 256, 128, 64        # hidden widths of the 1x1-conv MLP
ROWS_PER_STEP = 16384            # pairwise positions per grid step (target)
CHUNK_ROWS = 4096                # pairwise positions per in-kernel sub-chunk


def _scorenet_kernel(a_ref, bp_ref, w2_ref, b2_ref, w3_ref, b3_ref,
                     w4_ref, b4_ref, o_ref, *, n_chunks):
    # a_ref : (1, ti, H1) l1_dtype -- x_i @ W1a + b1   (varies with the i tile)
    # bp_ref: (1, tj, H1) l1_dtype -- x_j @ W1b        (varies with the j tile)
    # w2/w3 : (H1, H2) / (H2, H3) in the matmul dtype (bf16 by default)
    # b2/b3 : (1, H2) / (1, H3) f32;  w4: (1, H3) f32;  b4: (1, 1) f32
    # o_ref : (1, ti, tj) f32   -- lane-dense score tile
    ti = a_ref.shape[1]
    tj = bp_ref.shape[1]
    mm_dtype = w2_ref.dtype
    ci = ti // n_chunks

    bp = bp_ref[0]                                            # (tj, H1)

    # Static unrolled sub-chunk loop: lets the scheduler overlap the VPU
    # layer-1 work of chunk k+1 with the MXU matmuls of chunk k, and bounds
    # the size of the materialized intermediates.
    for c in range(n_chunks):
        a_c = a_ref[0, c * ci:(c + 1) * ci, :]                # (ci, H1)

        # Layer 1: pairwise cat(x_i, x_j) + 1x1 conv == broadcast-add of the
        # two per-point projections (VPU; bf16 on v6e/v7x, f32 on v5e).
        h1 = jnp.maximum(a_c[:, None, :] + bp[None, :, :], 0.0)   # (ci, tj, H1)
        h1 = h1.reshape(ci * tj, H1).astype(mm_dtype)  # tj % 8 == 0: layout no-op

        # Layers 2 & 3 on the MXU, f32 accumulation; bias + ReLU in f32.
        h2 = jnp.dot(h1, w2_ref[...], preferred_element_type=jnp.float32)
        h2 = jnp.maximum(h2 + b2_ref[...], 0.0).astype(mm_dtype)
        h3 = jnp.dot(h2, w3_ref[...], preferred_element_type=jnp.float32)
        h3 = jnp.maximum(h3 + b3_ref[...], 0.0)               # (ci*tj, H3) f32

        # Layer 4 (H3 -> 1): VPU multiply + lane reduce, producing the
        # lane-dense (ci, tj) tile directly.
        # TODO(synk): if the XLU reduce ever binds on v6e/v7x, move this
        # contraction onto the MXU (it has slack cycles here).
        scores = jnp.sum(h3.reshape(ci, tj, H3) * w4_ref[...], axis=-1)
        o_ref[0, c * ci:(c + 1) * ci, :] = (scores + b4_ref[...]).astype(o_ref.dtype)


def _fold_bn(w_t, b, gamma, beta, mean, var):
    """Fold BatchNorm (eval mode) into an (in, out) weight + bias."""
    scale = gamma / jnp.sqrt(var + EPS)
    return w_t * scale[None, :], (b - mean) * scale + beta


def _folded(params):
    w1, b1 = _fold_bn(params["w1"], params["b1"], params["g1"],
                      params["be1"], params["m1"], params["v1"])
    w2, b2 = _fold_bn(params["w2"], params["b2"], params["g2"],
                      params["be2"], params["m2"], params["v2"])
    w3, b3 = _fold_bn(params["w3"], params["b3"], params["g3"],
                      params["be3"], params["m3"], params["v3"])
    return w1, b1, w2, b2, w3, b3, params["w4"], params["b4"]


def _chip_defaults():
    """(layer-1 dtype, scoped-VMEM limit) for the local TPU generation."""
    try:
        kind = jax.devices()[0].device_kind.lower()
    except Exception:
        kind = ""
    if any(t in kind for t in ("v2", "v3", "v4", "v5")):
        # No bf16 VPU path on these generations; 128 MiB physical VMEM.
        return jnp.float32, 64 * 1024 * 1024
    if "v6" in kind:
        return jnp.bfloat16, 64 * 1024 * 1024
    # v7x (and unknown/newer): bf16 VPU, but only 64 MiB physical VMEM.
    return jnp.bfloat16, 48 * 1024 * 1024


def _tile_sizes(n, target_rows):
    """Pad n and pick (n_padded, ti, tj); tiles stay large and lane-dense."""
    if n <= 256:
        np_ = max(8, -(-n // 8) * 8)          # pad to a multiple of 8
        ti, tj = np_, np_                     # full-extent (lane-dense) j tile
        max_ti = (target_rows // tj) // 8 * 8
        if np_ * np_ > target_rows and max_ti >= 8:
            for cand in range(min(np_ - 8, max_ti), 7, -8):
                if np_ % cand == 0:           # ti must divide the padded extent
                    ti = cand
                    break
        return np_, ti, tj
    tj = 256
    np_ = -(-n // tj) * tj                    # pad to a multiple of 256
    ti = max(8, min(256, (target_rows // tj) // 8 * 8))
    while 256 % ti:                           # ti must divide 256 (hence np_)
        ti -= 8
    return np_, ti, tj


def _pick_chunks(ti, tj, chunk_rows=CHUNK_ROWS):
    """Equal row sub-chunks per grid step (sublane-aligned slices only)."""
    valid = [nc for nc in (1, 2, 4, 8)
             if ti % nc == 0 and (nc == 1 or (ti // nc) % 8 == 0)]
    for nc in valid:
        if (ti // nc) * tj <= chunk_rows:
            return nc
    return valid[-1]


def init_scorenet_params(in_ch, key):
    """in_ch = number of channels AFTER the cat (i.e. 2 * x channels)."""
    dims = [(in_ch, H1), (H1, H2), (H2, H3), (H3, 1)]
    keys = jax.random.split(key, 16)
    params = {}
    ki = 0
    for li, (ci, co) in enumerate(dims, start=1):
        params[f"w{li}"] = 0.1 * jax.random.normal(keys[ki], (ci, co), jnp.float32)
        ki += 1
        params[f"b{li}"] = 0.1 * jax.random.normal(keys[ki], (co,), jnp.float32)
        ki += 1
    for li, (_, co) in enumerate(dims[:3], start=1):  # bn1..bn3
        params[f"g{li}"] = 0.5 + jax.random.uniform(keys[ki], (co,), jnp.float32)
        params[f"be{li}"] = 0.1 * jax.random.normal(keys[ki], (co,), jnp.float32)
        params[f"m{li}"] = 0.1 * jax.random.normal(keys[ki], (co,), jnp.float32)
        params[f"v{li}"] = 0.5 + jax.random.uniform(keys[ki], (co,), jnp.float32)
        ki += 1
    return params


def scorenet_forward(x, params, *, l1_dtype=None, mm_dtype=jnp.bfloat16,
                     rows_per_step=ROWS_PER_STEP):
    """x: (B, C, N) float32 -> (B, N, N) float32 (matches ScoreNet(x)[:, 0])."""
    B, C, N = x.shape
    w1, b1, w2, b2, w3, b3, w4, b4 = _folded(params)
    assert w1.shape[0] == 2 * C, "ScoreNet in_ch must equal 2 * x channels"

    auto_l1, vmem_limit = _chip_defaults()
    if l1_dtype is None:
        l1_dtype = auto_l1

    Np, ti, tj = _tile_sizes(N, rows_per_step)
    n_chunks = _pick_chunks(ti, tj)

    xt = jnp.transpose(x, (0, 2, 1)).astype(jnp.float32)      # (B, N, C)
    if Np != N:
        xt = jnp.pad(xt, ((0, 0), (0, Np - N), (0, 0)))

    # Split conv1 along its input channels: rows [:C] act on x_i, rows [C:]
    # on x_j.  These per-point projections replace the pairwise feature map.
    a = (jnp.einsum("bnc,ch->bnh", xt, w1[:C]) + b1).astype(l1_dtype)
    bpj = jnp.einsum("bnc,ch->bnh", xt, w1[C:]).astype(l1_dtype)

    w2m = w2.astype(mm_dtype)
    w3m = w3.astype(mm_dtype)
    b2r = b2.reshape(1, H2).astype(jnp.float32)
    b3r = b3.reshape(1, H3).astype(jnp.float32)
    w4r = w4.reshape(1, H3).astype(jnp.float32)
    b4r = b4.reshape(1, 1).astype(jnp.float32)

    grid = (B, Np // ti, Np // tj)

    rows_total = B * Np * Np
    l1_item = jnp.dtype(l1_dtype).itemsize
    mm_item = jnp.dtype(mm_dtype).itemsize
    flops = 2 * rows_total * (H1 * H2 + H2 * H3 + H3) + 2 * rows_total * H1
    bytes_accessed = (a.size * l1_item                    # A tiles (reused over j)
                      + bpj.size * l1_item * (Np // ti)   # Bp re-read per i tile
                      + rows_total * 4                    # lane-dense output
                      + (w2m.size + w3m.size) * mm_item)
    cost = pl.CostEstimate(flops=int(flops), transcendentals=0,
                           bytes_accessed=int(bytes_accessed))

    out = pl.pallas_call(
        functools.partial(_scorenet_kernel, n_chunks=n_chunks),
        out_shape=jax.ShapeDtypeStruct((B, Np, Np), jnp.float32),
        grid=grid,
        in_specs=[
            pl.BlockSpec((1, ti, H1), lambda b, i, j: (b, i, 0)),   # A (i tile)
            pl.BlockSpec((1, tj, H1), lambda b, i, j: (b, j, 0)),   # Bp (j tile)
            pl.BlockSpec((H1, H2), lambda b, i, j: (0, 0)),         # w2 (full)
            pl.BlockSpec((1, H2), lambda b, i, j: (0, 0)),          # b2
            pl.BlockSpec((H2, H3), lambda b, i, j: (0, 0)),         # w3 (full)
            pl.BlockSpec((1, H3), lambda b, i, j: (0, 0)),          # b3
            pl.BlockSpec((1, H3), lambda b, i, j: (0, 0)),          # w4 row
            pl.BlockSpec((1, 1), lambda b, i, j: (0, 0)),           # b4
        ],
        out_specs=pl.BlockSpec((1, ti, tj), lambda b, i, j: (b, i, j)),
        compiler_params=pltpu.CompilerParams(
            dimension_semantics=("parallel", "parallel", "parallel"),
            vmem_limit_bytes=vmem_limit),
        cost_estimate=cost,
    )(a, bpj, w2m, b2r, w3m, b3r, w4r, b4r)

    return out[:, :N, :N]


def scorenet_reference(x, params, *, l1_dtype=jnp.float32, mm_dtype=jnp.float32):
    """Plain-JAX ScoreNet forward (eval-mode BN).  The dtype knobs mirror the
    kernel's bf16 paths (layer-1 pairwise add, layer-2/3 matmul operands) so a
    tight check compares identical math; pass f32/f32 for module semantics."""
    B, C, N = x.shape
    w1, b1, w2, b2, w3, b3, w4, b4 = _folded(params)
    xt = jnp.transpose(x, (0, 2, 1))                           # (B, N, C)
    # conv1 on cat(x_i, x_j) == x_i @ W1a + x_j @ W1b + b1 (same split as kernel)
    a = (jnp.einsum("bnc,ch->bnh", xt, w1[:C]) + b1).astype(l1_dtype)
    bp = jnp.einsum("bnc,ch->bnh", xt, w1[C:]).astype(l1_dtype)
    h = jnp.maximum(a[:, :, None, :] + bp[:, None, :, :], 0.0)  # (B, N, N, H1)
    h = h.astype(jnp.float32).reshape(B * N * N, H1)

    def mm(v, w):
        return jnp.dot(v.astype(mm_dtype), w.astype(mm_dtype),
                       preferred_element_type=jnp.float32)

    h = jnp.maximum(mm(h, w2) + b2, 0.0)
    h = jnp.maximum(mm(h, w3) + b3, 0.0)
    h = jnp.dot(h, w4) + b4
    return h.reshape(B, N, N)


if __name__ == "__main__":
    key = jax.random.PRNGKey(0)
    kx, kp = jax.random.split(key)

    B, C, N = 2, 4, 16          # input x: (B, C, N); n_points = N
    in_ch = 2 * C               # ScoreNet(in_ch) sees cat(x_i, x_j) channels

    x = jax.random.normal(kx, (B, C, N), jnp.float32)
    params = init_scorenet_params(in_ch, kp)

    l1_dtype, _ = _chip_defaults()

    y = scorenet_forward(x, params)
    y = jax.block_until_ready(y)
    assert y.shape == (B, N, N)

    # Tight check vs. a reference that mirrors the kernel's dtype choices
    # (bf16 layer-1 add on v6e/v7x, bf16 matmul operands, f32 accumulation).
    y_ref = scorenet_reference(x, params, l1_dtype=l1_dtype, mm_dtype=jnp.bfloat16)
    assert jnp.allclose(y, y_ref, atol=2e-2, rtol=2e-2), \
        float(jnp.max(jnp.abs(y - y_ref)))

    # Loose sanity check vs. pure-f32 module semantics (bf16 rounding only).
    y_f32 = scorenet_reference(x, params, l1_dtype=jnp.float32,
                               mm_dtype=jnp.float32)
    assert jnp.allclose(y, y_f32, atol=0.25, rtol=0.05)

    print("KERNEL_OK")
</pallas_src>

<mosaic_0001>
module attributes {stable_mosaic.version = 11 : i64} {
  func.func @_scorenet_kernel(%arg0: i32, %arg1: i32, %arg2: i32, %arg3: memref<1x16x256xbf16, #tpu.memory_space<vmem>>, %arg4: memref<1x16x256xbf16, #tpu.memory_space<vmem>>, %arg5: memref<256x128xbf16, #tpu.memory_space<vmem>>, %arg6: memref<1x128xf32, #tpu.memory_space<vmem>>, %arg7: memref<128x64xbf16, #tpu.memory_space<vmem>>, %arg8: memref<1x64xf32, #tpu.memory_space<vmem>>, %arg9: memref<1x64xf32, #tpu.memory_space<vmem>>, %arg10: memref<1x1xf32, #tpu.memory_space<vmem>>, %arg11: memref<1x16x16xf32, #tpu.memory_space<vmem>>) attributes {dimension_semantics = [#tpu.dimension_semantics<parallel>, #tpu.dimension_semantics<parallel>, #tpu.dimension_semantics<parallel>], iteration_bounds = array<i64: 2, 1, 1>, scalar_prefetch = 0 : i64, scratch_operands = 0 : i64, tpu.core_type = #tpu.core_type<tc>, window_params = [{transform_indices = @transform_0, window_bounds = array<i64: 1, 16, 256>}, {transform_indices = @transform_1, window_bounds = array<i64: 1, 16, 256>}, {pipeline_mode = #tpu.pipeline_mode<synchronous>, transform_indices = @transform_2, window_bounds = array<i64: 256, 128>}, {pipeline_mode = #tpu.pipeline_mode<synchronous>, transform_indices = @transform_3, window_bounds = array<i64: 1, 128>}, {pipeline_mode = #tpu.pipeline_mode<synchronous>, transform_indices = @transform_4, window_bounds = array<i64: 128, 64>}, {pipeline_mode = #tpu.pipeline_mode<synchronous>, transform_indices = @transform_5, window_bounds = array<i64: 1, 64>}, {pipeline_mode = #tpu.pipeline_mode<synchronous>, transform_indices = @transform_6, window_bounds = array<i64: 1, 64>}, {pipeline_mode = #tpu.pipeline_mode<synchronous>, transform_indices = @transform_7, window_bounds = array<i64: 1, 1>}, {transform_indices = @transform_8, window_bounds = array<i64: 1, 16, 16>}]} {
    %c0 = arith.constant 0 : index
    %c0_0 = arith.constant 0 : index
    %c0_1 = arith.constant 0 : index
    %0 = vector.load %arg4[%c0, %c0_0, %c0_1] : memref<1x16x256xbf16, #tpu.memory_space<vmem>>, vector<1x16x256xbf16>
    %1 = vector.shape_cast %0 : vector<1x16x256xbf16> to vector<16x256xbf16>
    %c0_2 = arith.constant 0 : index
    %c0_3 = arith.constant 0 : index
    %c0_4 = arith.constant 0 : index
    %2 = vector.load %arg3[%c0_2, %c0_3, %c0_4] : memref<1x16x256xbf16, #tpu.memory_space<vmem>>, vector<1x16x256xbf16>
    %3 = vector.shape_cast %2 : vector<1x16x256xbf16> to vector<16x256xbf16>
    %4 = vector.shape_cast %3 : vector<16x256xbf16> to vector<16x1x256xbf16>
    %5 = vector.shape_cast %1 : vector<16x256xbf16> to vector<1x16x256xbf16>
    %6 = vector.broadcast %4 : vector<16x1x256xbf16> to vector<16x16x256xbf16>
    %7 = vector.broadcast %5 : vector<1x16x256xbf16> to vector<16x16x256xbf16>
    %8 = arith.addf %6, %7 : vector<16x16x256xbf16>
    %cst = arith.constant 0.000000e+00 : bf16
    %9 = vector.broadcast %cst : bf16 to vector<16x16x256xbf16>
    %10 = arith.maximumf %8, %9 : vector<16x16x256xbf16>
    %11 = vector.shape_cast %10 : vector<16x16x256xbf16> to vector<256x256xbf16>
    %c0_5 = arith.constant 0 : index
    %c0_6 = arith.constant 0 : index
    %12 = vector.load %arg5[%c0_5, %c0_6] : memref<256x128xbf16, #tpu.memory_space<vmem>>, vector<256x128xbf16>
    %cst_7 = arith.constant dense<0.000000e+00> : vector<256x128xf32>
    %13 = tpu.matmul %11, %12, %cst_7 {dimension_numbers = #tpu.dot_dimension_numbers<[1], [0], [0], [1], [0, 0, 1, 1], [], []>} : vector<256x256xbf16>, vector<256x128xbf16>, vector<256x128xf32> -> vector<256x128xf32>
    %c0_8 = arith.constant 0 : index
    %c0_9 = arith.constant 0 : index
    %14 = vector.load %arg6[%c0_8, %c0_9] : memref<1x128xf32, #tpu.memory_space<vmem>>, vector<1x128xf32>
    %15 = vector.broadcast %14 : vector<1x128xf32> to vector<256x128xf32>
    %16 = arith.addf %13, %15 : vector<256x128xf32>
    %cst_10 = arith.constant 0.000000e+00 : f32
    %17 = vector.broadcast %cst_10 : f32 to vector<256x128xf32>
    %18 = arith.maximumf %16, %17 : vector<256x128xf32>
    %19 = arith.truncf %18 : vector<256x128xf32> to vector<256x128xbf16>
    %c0_11 = arith.constant 0 : index
    %c0_12 = arith.constant 0 : index
    %20 = vector.load %arg7[%c0_11, %c0_12] : memref<128x64xbf16, #tpu.memory_space<vmem>>, vector<128x64xbf16>
    %cst_13 = arith.constant dense<0.000000e+00> : vector<256x64xf32>
    %21 = tpu.matmul %19, %20, %cst_13 {dimension_numbers = #tpu.dot_dimension_numbers<[1], [0], [0], [1], [0, 0, 1, 1], [], []>} : vector<256x128xbf16>, vector<128x64xbf16>, vector<256x64xf32> -> vector<256x64xf32>
    %c0_14 = arith.constant 0 : index
    %c0_15 = arith.constant 0 : index
    %22 = vector.load %arg8[%c0_14, %c0_15] : memref<1x64xf32, #tpu.memory_space<vmem>>, vector<1x64xf32>
    %23 = vector.broadcast %22 : vector<1x64xf32> to vector<256x64xf32>
    %24 = arith.addf %21, %23 : vector<256x64xf32>
    %cst_16 = arith.constant 0.000000e+00 : f32
    %25 = vector.broadcast %cst_16 : f32 to vector<256x64xf32>
    %26 = arith.maximumf %24, %25 : vector<256x64xf32>
    %27 = vector.shape_cast %26 : vector<256x64xf32> to vector<16x16x64xf32>
    %c0_17 = arith.constant 0 : index
    %c0_18 = arith.constant 0 : index
    %28 = vector.load %arg9[%c0_17, %c0_18] : memref<1x64xf32, #tpu.memory_space<vmem>>, vector<1x64xf32>
    %29 = vector.shape_cast %28 : vector<1x64xf32> to vector<1x1x64xf32>
    %30 = vector.broadcast %29 : vector<1x1x64xf32> to vector<16x16x64xf32>
    %31 = arith.mulf %27, %30 : vector<16x16x64xf32>
    %cst_19 = arith.constant dense<0.000000e+00> : vector<16x16xf32>
    %32 = vector.multi_reduction <add>, %31, %cst_19 [2] : vector<16x16x64xf32> to vector<16x16xf32>
    %c0_20 = arith.constant 0 : index
    %c0_21 = arith.constant 0 : index
    %33 = vector.load %arg10[%c0_20, %c0_21] : memref<1x1xf32, #tpu.memory_space<vmem>>, vector<1x1xf32>
    %34 = vector.broadcast %33 : vector<1x1xf32> to vector<16x16xf32>
    %35 = arith.addf %32, %34 : vector<16x16xf32>
    %c0_22 = arith.constant 0 : index
    %c0_23 = arith.constant 0 : index
    %c0_24 = arith.constant 0 : index
    %36 = vector.load %arg11[%c0_22, %c0_23, %c0_24] : memref<1x16x16xf32, #tpu.memory_space<vmem>>, vector<1x16x16xf32>
    %37 = vector.shape_cast %36 : vector<1x16x16xf32> to vector<16x16xf32>
    %38 = vector.shape_cast %35 : vector<16x16xf32> to vector<1x16x16xf32>
    tpu.vector_store %arg11[%c0_22, %c0_23, %c0_24], %38 {strides = array<i32>} : memref<1x16x16xf32, #tpu.memory_space<vmem>>, vector<1x16x16xf32>,
    return
  }
  func.func @transform_0(%arg0: i32, %arg1: i32, %arg2: i32) -> (i32, i32, i32) {
    %c0_i32 = arith.constant 0 : i32
    %c0_i32_0 = arith.constant 0 : i32
    return %arg0, %arg1, %c0_i32 : i32, i32, i32
  }
  func.func @transform_1(%arg0: i32, %arg1: i32, %arg2: i32) -> (i32, i32, i32) {
    %c0_i32 = arith.constant 0 : i32
    %c0_i32_0 = arith.constant 0 : i32
    return %arg0, %arg2, %c0_i32 : i32, i32, i32
  }
  func.func @transform_2(%arg0: i32, %arg1: i32, %arg2: i32) -> (i32, i32) {
    %c0_i32 = arith.constant 0 : i32
    %c0_i32_0 = arith.constant 0 : i32
    %c0_i32_1 = arith.constant 0 : i32
    return %c0_i32, %c0_i32_0 : i32, i32
  }
  func.func @transform_3(%arg0: i32, %arg1: i32, %arg2: i32) -> (i32, i32) {
    %c0_i32 = arith.constant 0 : i32
    %c0_i32_0 = arith.constant 0 : i32
    %c0_i32_1 = arith.constant 0 : i32
    return %c0_i32, %c0_i32_0 : i32, i32
  }
  func.func @transform_4(%arg0: i32, %arg1: i32, %arg2: i32) -> (i32, i32) {
    %c0_i32 = arith.constant 0 : i32
    %c0_i32_0 = arith.constant 0 : i32
    %c0_i32_1 = arith.constant 0 : i32
    return %c0_i32, %c0_i32_0 : i32, i32
  }
  func.func @transform_5(%arg0: i32, %arg1: i32, %arg2: i32) -> (i32, i32) {
    %c0_i32 = arith.constant 0 : i32
    %c0_i32_0 = arith.constant 0 : i32
    %c0_i32_1 = arith.constant 0 : i32
    return %c0_i32, %c0_i32_0 : i32, i32
  }
  func.func @transform_6(%arg0: i32, %arg1: i32, %arg2: i32) -> (i32, i32) {
    %c0_i32 = arith.constant 0 : i32
    %c0_i32_0 = arith.constant 0 : i32
    %c0_i32_1 = arith.constant 0 : i32
    return %c0_i32, %c0_i32_0 : i32, i32
  }
  func.func @transform_7(%arg0: i32, %arg1: i32, %arg2: i32) -> (i32, i32) {
    %c0_i32 = arith.constant 0 : i32
    %c0_i32_0 = arith.constant 0 : i32
    %c0_i32_1 = arith.constant 0 : i32
    return %c0_i32, %c0_i32_0 : i32, i32
  }
  func.func @transform_8(%arg0: i32, %arg1: i32, %arg2: i32) -> (i32, i32, i32) {
    %c0_i32 = arith.constant 0 : i32
    return %arg0, %arg1, %arg2 : i32, i32, i32
  }
}

</mosaic_0001>

<bundles_post_ra>
// kernel: tpu_custom_call.1
= control target key start
LH: loop header
LB: loop body
LE: loop exit
PB: predicated region body
PF: predicated region fallthrough
CT: control target
= control target key end

     0   :  { %s3080_s0 = inlined_call_operand.vmem [shape: bf16[2,16,256], index: 0, kind: input, shape index: {}]   ;;  %s3081_s1 = inlined_call_operand.vmem [shape: bf16[2,16,256], index: 1, kind: input, shape index: {}]   ;;  %s3082_s2 = inlined_call_operand.hbm [shape: bf16[256,128], index: 2, kind: input, shape index: {}]   ;;  %s3083_s3 = inlined_call_operand.vmem [shape: f32[1,128], index: 3, kind: input, shape index: {}]   ;;  %s3084_s4 = inlined_call_operand.vmem [shape: bf16[128,64], index: 4, kind: input, shape index: {}]   ;;  %s3085_s5 = inlined_call_operand.vmem [shape: f32[1,64], index: 5, kind: input, shape index: {}]   ;;  %s3086_s6 = inlined_call_operand.vmem [shape: f32[1,64], index: 6, kind: input, shape index: {}]   ;;  %s3087_s7 = inlined_call_operand.<no memory space> [shape: f32[1,1], index: 7, kind: input, shape index: {}]   ;;  %s3088_s8 = inlined_call_operand.hbm [shape: f32[2,16,16], index: 8, kind: output, shape index: {}]  }
   0x1   :  { %v13_v0 = vstv %s3087_s7 }
   0x2   :  { %14 = vst [vmem:[#allocation2] sm:$0x1] %v13_v0 }
   0x3   :  { %15 = vsyncpa [#allocation4], 0 }
   0x4   :  { %16 = vsyncpa [#allocation5], 0 }
   0x5   :  { %18 = vsyncpa [#allocation5 + $0x1], 0  ;;  %s2468_s29 = smov 0   ;;  %s2470_s30 = smov 0  }
   0x6   :  { %s2472_s9 = smov 0   ;;  %s2474_s10 = smov 0  }
   0x7   :  { %s2476_s11 = smov 0   ;;  %s2478_s12 = smov 0  }
   0x8 LB: > { %s2051_s7 = sadd.s32 4294967295, %s2412_s12   ;;  %s2052_s13 = sadd.s32 4294967294, %s2412_s12   ;;  %s2412_s12 = sphi %s2478_s12, %s24_s12   ;;  %s2408_s11 = sphi %s2476_s11, %s3095_s11   ;;  %s2404_s10 = sphi %s2474_s10, %s3094_s10   ;;  %s2400_s9 = sphi %s2472_s9, %s3093_s9   ;;  %s2396_s30 = sphi %s2470_s30, %s3092_s30   ;;  %s2392_s29 = sphi %s2468_s29, %s3091_s29  }
   0x9   : > { %s43_s14 = sadd.s32 1, %s2408_s11  ;;  %s236_s15 = sadd.s32 1, %s2400_s9 }
   0xa   : > { %p45_p0 = scmp.ge.s32.totalorder %s43_s14, 2  ;;  %p246_p1 = scmp.ne.s32.totalorder %s2400_s9, %s2396_s30 }
   0xb   : > { %p247_p2 = scmp.eq.s32.totalorder %s2051_s7, 1  ;;  %p252_p3 = scmp.ne.s32.totalorder %s2396_s30, %s2392_s29 }
   0xc   : > { %s3097_s14 = smov (%p45_p0, %s43_s14), 0  ;;  %p253_p5 = scmp.eq.s32.totalorder %s2052_s13, 1 }
   0xd   : > { %p2508_p4 = por %p247_p2, %p246_p1  ;;  %s229_s17 = ssub.s32 %s2408_s11, %s3097_s14 }
   0xe   : > { %p2053_p6 = scmp.ge.s32.totalorder %s2412_s12, 1  ;;  %p234_p7 = scmp.eq.s32.totalorder %s229_s17, 0 }
   0xf   : > { %p2515_p8 = por %p253_p5, %p252_p3  ;;  %p260_p9 = scmp.lt.s32.totalorder %s2412_s12, 3 }
  0x10   : > { %s2521_s19 = scalar_select %p234_p7, %s2400_s9, %s236_s15  }
  0x11   : > { %p261_p10 = pnand %p2053_p6, %p260_p9  ;;  %p2237_p11 = scmp.eq.s32.totalorder %s2051_s7, 0 }
  0x12   : > { %s271_s22 = sshll.u32 %s3082_s2, 4  ;;  %s2414_s23 = smov [#allocation3]   ;;  %s272_s22 = int_to_ptr.hbm [resolvable:$true] %s271_s22 }
  0x13   : > { %p2229_p12 = pneg %p261_p10  ;;  %s273_s24 = sshll.u32 %s2414_s23, 4  ;;  %s274_s24 = int_to_ptr.vmem [resolvable:$true] %s273_s24 }
  0x14   : > { %s2415_s25 = smov 64   ;;  %s2416_s26 = smov 4  }
  0x15   : > { %p2230_p13 = pnand %p2237_p11, %p2229_p12  ;;  %332 = sbr.rel (%p261_p10) target bundleno = 658 (0x292), region = 52 }
  0x17   : > { %2232 = dma.hbm_to_vmem [thread:$0]  (!%p2230_p13), %s272_s22, 2048, %s274_s24, [#allocation4], %s2415_s25, %s2415_s25, %s2416_s26  }
  0x1a   : > { %2383 = dma.done.wait (%p2237_p11), [#allocation4], 2048  }
  0x1b   : > { %2385 = vsyncadd (%p2237_p11), [#allocation4], 4294965248  ;;  %p383_p0 = scmp.lt.s32.totalorder %s2404_s10, 1  ;;  %v2181_v1 = vld [vmem:[#allocation3 + $0x38] sm:$0xff]  ;;  %v2180_v3 = vld [vmem:[#allocation3 + $0x30] sm:$0xff]  ;;  %vm413_vm0 = vcmask 1040384  }
  0x1c   : > { %v2528_v2 = vld [vmem:[#allocation3 + $0x78] sm:$0xff]  ;;  %1219 = vmatpush.bf16.msra.mxu0 %v2181_v1  ;;  %2199 = vmatpush.bf16.msra.mxu3 %v2181_v1  ;;  %v2531_v4 = vld [vmem:[#allocation3 + $0x70] sm:$0xff]  ;;  %v2179_v5 = vld [vmem:[#allocation3 + $0x28] sm:$0xff]  ;;  %vm422_vm1 = vcmask 1042434   ;;  %vm418_vm2 = vcmask 1041409   ;;  %vm426_vm3 = vcmask 1043459  }
  0x1d   : > { %s384_s27 = scalar_select %p383_p0, %s2404_s10, 1  ;;  %1308 = vmatpush.bf16.msra.mxu1 %v2528_v2  ;;  %v2536_v6 = vld [vmem:[#allocation3 + $0x68] sm:$0xff]  ;;  %v2178_v14 = vld [vmem:[#allocation3 + $0x20] sm:$0xff]  ;;  %v2177_v31 = vld [vmem:[#allocation3 + $0x18] sm:$0xff]  ;;  %vm1670_vm4 = vcmask 523264   ;;  %vm1843_vm5 = vcmask 130112  }
  0x1e   : > { %v2559_v19 = vld [vmem:[#allocation3 + $0x60] sm:$0xff]  ;;  %v2575_v36 = vld [vmem:[#allocation3 + $0x58] sm:$0xff]  ;;  %v2176_v49 = vld [vmem:[#allocation3 + $0x10] sm:$0xff]  ;;  %vm1893_vm6 = vcmask 1044484   ;;  %vm1895_vm7 = vcmask 1045509   ;;  %vm1897_vm8 = vcmask 1046534  }
  0x1f   : > { %s2172_s28 = sshll.u32 %s384_s27, 4  ;;  %v2582_v54 = vld [vmem:[#allocation3 + $0x50] sm:$0xff]  ;;  %vm1899_vm9 = vcmask 1047559   ;;  %vm1910_vm10 = vcmask 130048  }
  0x20   : > { %s391_s15 = scalar_lea.vmem %s3080_s0, %s2172_s28  ;;  %s402_s21 = scalar_lea.vmem %s3081_s1, %s2172_s28  ;;  %1220 = vmatpush.bf16.msra.mxu0 %v2180_v3  ;;  %2200 = vmatpush.bf16.msra.mxu3 %v2180_v3 }
  0x21   : > { %v2541_v7 = vld [vmem:[%s391_s15] sm:$0xff]  ;;  %v2543_v8 = vld [vmem:[%s391_s15 + $0x8] sm:$0xff]  ;;  %1309 = vmatpush.bf16.msra.mxu1 %v2531_v4  ;;  %s379_s15 = sand.u32 1, %s2396_s30  }
  0x22   : > { %v2547_v9 = vrot.slane %v2541_v7, 3  ;;  %v2550_v10 = vrot.slane %v2543_v8, 3  ;;  %v405_v11 = vld [vmem:[%s402_s21] sm:$0xff]  ;;  %v406_v15 = vld [vmem:[%s402_s21 + $0x8] sm:$0xff]  ;;  %s2058_s17 = sshll.u32 %s379_s15, 4  ;;  %s2198_s21 = sshll.u32 %s2404_s10, 4 }
  0x23   : > { %v2561_v20 = vunpack.c.l.bf16 %v405_v11  ;;  %v2563_v21 = vunpack.c.h.bf16 %v405_v11  ;;  %v2568_v27 = vunpack.c.l.bf16 %v406_v15  ;;  %v2570_v28 = vunpack.c.h.bf16 %v406_v15  ;;  %v2589_v15 = vld [vmem:[#allocation3 + $0x48] sm:$0xff]  ;;  %s2995_s20 = scalar_lea.vmem [#allocation6], %s2058_s17  ;;  %s1928_s24 = scalar_lea.hbm %s3088_s8, %s2198_s21 }
  0x24   : > { %v416_v12 = vsel %vm413_vm0, %v2541_v7, %v2547_v9  ;;  %v437_v13 = vsel %vm422_vm1, %v2543_v8, %v2550_v10  ;;  %1221 = vmatpush.bf16.msra.mxu0 %v2179_v5  ;;  %2201 = vmatpush.bf16.msra.mxu3 %v2179_v5  ;;  %v419_v22 = vsel %vm418_vm2, %v2541_v7, %v2547_v9  ;;  %v2175_v5 = vld [vmem:[#allocation3 + $0x8] sm:$0xff]  ;;  %s1929_s10 = sshll.u32 %s2995_s20, 4  ;;  %s1931_s25 = sshll.u32 %s1928_s24, 4  ;;  %s1930_s10 = int_to_ptr.vmem [resolvable:$true] %s1929_s10  ;;  %s1932_s25 = int_to_ptr.hbm [resolvable:$true] %s1931_s25 }
  0x25   : > { %v2063_v16 = vpack.i.b16 %v416_v12, %v416_v12  ;;  %v439_v17 = vrot.slane %v437_v13, 2  ;;  %v444_v18 = vunpack.i.h.s16 %v416_v12  ;;  %1310 = vmatpush.bf16.msra.mxu1 %v2536_v6  ;;  %v2572_v30 = vrot.slane %v419_v22, 1  ;;  %s1914_s26 = scalar_lea.sflag [#allocation5], %s379_s15  ;;  %s2344_s27 = sshra.s32 %s1932_s25, 4  ;;  %s2345_s27 = int_to_ptr.hbm [resolvable:$true] %s2344_s27 }
  0x26   : > { %s2346_s28 = scalar_lea.hbm %s2345_s27, 16  ;;  %s2350_s17 = scalar_lea.hbm %s3088_s8, 32 }
  0x27   : > { %v475_v23 = vperm.slane %v2063_v16, 0  ;;  %v476_v24 = vperm.slane %v2063_v16, 1  ;;  %v2069_v25 = vpack.i.b16 %v439_v17, %v439_v17  ;;  %v460_v26 = vpack.i.b16 %v444_v18, %v444_v18  ;;  %p2347_p1 = scmp.ne.s32.totalorder %s2345_s27, %s2346_s28  ;;  %p2351_p5 = scmp.lt.s32.totalorder %s2345_s27, %s3088_s8 }
  0x28   : > { %v456_v29 = vunpack.i.h.s16 %v439_v17  ;;  %1222 = vmatpush.bf16.msra.mxu0 %v2178_v14  ;;  %2202 = vmatpush.bf16.msra.mxu3 %v2178_v14  ;;  %v2579_v40 = vpack.i.b16 %v2572_v30, %v2572_v30  ;;  %p2352_p6 = scmp.lt.s32.totalorder %s2350_s17, %s2346_s28 }
  0x29   : > { %v508_v32 = vpack.i.b16 %v475_v23, %v475_v23  ;;  %v512_v33 = vpack.i.b16 %v476_v24, %v476_v24  ;;  %v499_v34 = vperm.slane %v2069_v25, 0  ;;  %v500_v35 = vperm.slane %v2069_v25, 1  ;;  %1311 = vmatpush.bf16.msra.mxu1 %v2559_v19  ;;  %p2348_p2 = pnand %p2347_p1, %p2508_p4 }
  0x2a   : > { %v477_v37 = vperm.slane %v460_v26, 0  ;;  %v478_v38 = vperm.slane %v460_v26, 1  ;;  %v472_v39 = vpack.i.b16 %v456_v29, %v456_v29  ;;  %p2353_p7 = por %p2352_p6, %p2351_p5 }
  0x2b   : > { %v510_v41 = vperm.slane %v508_v32, 0  ;;  %v514_v42 = vperm.slane %v512_v33, 0  ;;  %v604_v43 = vpack.i.b16 %v499_v34, %v499_v34  ;;  %v608_v44 = vpack.i.b16 %v500_v35, %v500_v35  ;;  %v2174_v34 = vld [vmem:[#allocation3] sm:$0xff]  ;;  %p2349_p3 = pneg %p2348_p2 }
  0x2c   : > { %v516_v45 = vpack.i.b16 %v477_v37, %v477_v37  ;;  %v520_v46 = vpack.i.b16 %v478_v38, %v478_v38  ;;  %v501_v47 = vperm.slane %v472_v39, 0  ;;  %v502_v48 = vperm.slane %v472_v39, 1  ;;  %1223 = vmatpush.bf16.msra.mxu0 %v2177_v31  ;;  %2203 = vmatpush.bf16.msra.mxu3 %v2177_v31 }
  0x2d   : > { %v635_v50 = vunpack.c.l.bf16 %v510_v41  ;;  %v636_v51 = vunpack.c.l.bf16 %v514_v42  ;;  %v606_v52 = vperm.slane %v604_v43, 0  ;;  %v610_v53 = vperm.slane %v608_v44, 0  ;;  %1312 = vmatpush.bf16.msra.mxu1 %v2575_v36  ;;  %v2598_v41 = vld [vmem:[#allocation3 + $0x40] sm:$0xff]  ;;  %p2354_p9 = pnand %p2353_p7, %p2349_p3 }
  0x2e   : > { %v518_v55 = vperm.slane %v516_v45, 0  ;;  %v522_v56 = vperm.slane %v520_v46, 0  ;;  %v612_v57 = vpack.i.b16 %v501_v47, %v501_v47  ;;  %v616_v58 = vpack.i.b16 %v502_v48, %v502_v48 }
  0x2f   : > { %v671_v59 = vadd.f32 %v2561_v20, %v635_v50  ;;  %v672_v60 = vadd.f32 %v2563_v21, %v636_v51  ;;  %v673_v61 = vadd.f32 %v2568_v27, %v635_v50  ;;  %v674_v62 = vadd.f32 %v2570_v28, %v636_v51 }
  0x30   : > { %v659_v63 = vunpack.c.l.bf16 %v606_v52  ;;  %v660_v0 = vunpack.c.l.bf16 %v610_v53  ;;  %v637_v1 = vunpack.c.l.bf16 %v518_v55  ;;  %v638_v3 = vunpack.c.l.bf16 %v522_v56  ;;  %1224 = vmatpush.bf16.msra.mxu0 %v2176_v49  ;;  %2204 = vmatpush.bf16.msra.mxu3 %v2176_v49 }
  0x31   : > { %v831_v11 = vmax.f32 %v671_v59, 0.0  ;;  %v832_v12 = vmax.f32 %v672_v60, 0.0  ;;  %v833_v13 = vmax.f32 %v673_v61, 0.0  ;;  %v834_v14 = vmax.f32 %v674_v62, 0.0  ;;  %1313 = vmatpush.bf16.msra.mxu1 %v2582_v54 }
  0x32   : > { %v719_v16 = vadd.f32 %v2561_v20, %v659_v63  ;;  %v720_v17 = vadd.f32 %v2563_v21, %v660_v0  ;;  %v721_v18 = vadd.f32 %v2568_v27, %v659_v63  ;;  %v722_v22 = vadd.f32 %v2570_v28, %v660_v0 }
  0x33   : > { %v895_v23 = vpack.c.bf16 %v832_v12, %v831_v11  ;;  %v896_v24 = vpack.c.bf16 %v834_v14, %v833_v13  ;;  %v675_v25 = vadd.f32 %v2561_v20, %v637_v1  ;;  %v676_v26 = vadd.f32 %v2563_v21, %v638_v3 }
  0x34   : > { %v879_v29 = vmax.f32 %v719_v16, 0.0  ;;  %v880_v31 = vmax.f32 %v720_v17, 0.0  ;;  %v881_v32 = vmax.f32 %v721_v18, 0.0  ;;  %v882_v33 = vmax.f32 %v722_v22, 0.0  ;;  %1225 = vmatpush.bf16.msra.mxu0 %v2175_v5  ;;  %2205 = vmatpush.bf16.msra.mxu3 %v2175_v5 }
  0x35   : > { %v995_v35 = vunpack.c.l.b16 %v895_v23  ;;  %v997_v37 = vunpack.c.l.b16 %v896_v24  ;;  %v996_v38 = vunpack.c.h.b16 %v895_v23  ;;  %v998_v39 = vunpack.c.h.b16 %v896_v24  ;;  %1314 = vmatpush.bf16.msra.mxu1 %v2589_v15 }
  0x36   : > { %v2600_v42 = vpack.c.bf16 %v880_v31, %v879_v29  ;;  %v2602_v43 = vpack.c.bf16 %v882_v33, %v881_v32  ;;  %v677_v44 = vadd.f32 %v2568_v27, %v637_v1  ;;  %v678_v45 = vadd.f32 %v2570_v28, %v638_v3 }
  0x37   : > { %v1059_v46 = vpack.c.b16 %v997_v37, %v995_v35  ;;  %v440_v47 = vsel %vm426_vm3, %v2543_v8, %v2550_v10  ;;  %v835_v50 = vmax.f32 %v675_v25, 0.0  ;;  %v836_v51 = vmax.f32 %v676_v26, 0.0 }
  0x38   : > { %v1043_v48 = vunpack.c.l.b16 %v2600_v42  ;;  %v1045_v49 = vunpack.c.l.b16 %v2602_v43  ;;  %1226 = vmatpush.bf16.msra.mxu0 %v2174_v34  ;;  %2206 = vmatpush.bf16.msra.mxu3 %v2174_v34  ;;  %v1060_v52 = vpack.c.b16 %v998_v39, %v996_v38  ;;  %v614_v53 = vperm.slane %v612_v57, 0 }
  0x39   : > { %v618_v55 = vperm.slane %v616_v58, 0  ;;  %v479_v56 = vperm.slane %v2579_v40, 0  ;;  %1315 = vmatpush.bf16.msra.mxu1 %v2598_v41  ;;  %v837_v60 = vmax.f32 %v677_v44, 0.0  ;;  %v838_v61 = vmax.f32 %v678_v45, 0.0 }
  0x3a   : > { %v1083_v59 = vpack.c.b16 %v1045_v49, %v1043_v48  ;;  %v480_v62 = vperm.slane %v2579_v40, 1  ;;  %v661_v63 = vunpack.c.l.bf16 %v614_v53  ;;  %v897_v1 = vpack.c.bf16 %v836_v51, %v835_v50 }
  0x3b   : > { %v662_v0 = vunpack.c.l.bf16 %v618_v55  ;;  %1227 = vmatmul.bf16.vlgmr.msra.gmra.mxu0 %v1059_v46  ;;  %v524_v3 = vpack.i.b16 %v479_v56, %v479_v56  ;;  %v442_v57 = vrot.slane %v440_v47, 3  ;;  %v898_v40 = vpack.c.bf16 %v838_v61, %v837_v60 }
  0x3c   : > { %2207 = vmatpush.bf16.msrb.mxu3 %v2528_v2  ;;  %v528_v5 = vpack.i.b16 %v480_v62, %v480_v62  ;;  %1316 = vmatmul.bf16.vlgmr.msra.gmra.mxu1 %v1060_v52  ;;  %v723_v58 = vadd.f32 %v2561_v20, %v661_v63  ;;  %v725_v12 = vadd.f32 %v2568_v27, %v661_v63  ;;  %v999_v26 = vunpack.c.l.b16 %v897_v1 }
  0x3d   : > { %1287 = vmatmul.bf16.vlgmr.msra.gmra.mxu3 %v1083_v59  ;;  %v724_v11 = vadd.f32 %v2563_v21, %v662_v0  ;;  %v726_v13 = vadd.f32 %v2570_v28, %v662_v0  ;;  %v526_v14 = vperm.slane %v524_v3, 0  ;;  %v2070_v25 = vpack.i.b16 %v442_v57, %v442_v57 }
  0x3e   : > { %v530_v2 = vperm.slane %v528_v5, 0  ;;  %v883_v16 = vmax.f32 %v723_v58, 0.0  ;;  %v885_v18 = vmax.f32 %v725_v12, 0.0  ;;  %v446_v32 = vunpack.i.h.s16 %v2572_v30 }
  0x3f   : > { %v884_v17 = vmax.f32 %v724_v11, 0.0  ;;  %v886_v22 = vmax.f32 %v726_v13, 0.0  ;;  %v639_v23 = vunpack.c.l.bf16 %v526_v14  ;;  %v1001_v33 = vunpack.c.l.b16 %v898_v40 }
  0x40   : > { %2208 = vmatpush.bf16.msrb.mxu3 %v2531_v4  ;;  %v640_v24 = vunpack.c.l.bf16 %v530_v2  ;;  %v1000_v34 = vunpack.c.h.b16 %v897_v1  ;;  %v1002_v35 = vunpack.c.h.b16 %v898_v40  ;;  %v458_v4 = vunpack.i.h.s16 %v442_v57 }
  0x41   : > { %v2620_v29 = vpack.c.bf16 %v884_v17, %v883_v16  ;;  %v2622_v31 = vpack.c.bf16 %v886_v22, %v885_v18  ;;  %v679_v37 = vadd.f32 %v2561_v20, %v639_v23  ;;  %v503_v38 = vperm.slane %v2070_v25, 0 }
  0x42   : > { %v504_v39 = vperm.slane %v2070_v25, 1  ;;  %v680_v46 = vadd.f32 %v2563_v21, %v640_v24  ;;  %v681_v47 = vadd.f32 %v2568_v27, %v639_v23  ;;  %v462_v49 = vpack.i.b16 %v446_v32, %v446_v32 }
  0x43   : > { %v1047_v44 = vunpack.c.l.b16 %v2620_v29  ;;  %v1049_v45 = vunpack.c.l.b16 %v2622_v31  ;;  %v620_v48 = vpack.i.b16 %v503_v38, %v503_v38  ;;  %v1061_v50 = vpack.c.b16 %v1001_v33, %v999_v26 }
  0x44   : > { %2209 = vmatpush.bf16.msrb.mxu3 %v2536_v6  ;;  %v624_v30 = vpack.i.b16 %v504_v39, %v504_v39  ;;  %v1062_v51 = vpack.c.b16 %v1002_v35, %v1000_v34  ;;  %v682_v6 = vadd.f32 %v2570_v28, %v640_v24  ;;  %v474_v52 = vpack.i.b16 %v458_v4, %v458_v4 }
  0x45   : > { %v622_v53 = vperm.slane %v620_v48, 0  ;;  %v481_v56 = vperm.slane %v462_v49, 0  ;;  %v482_v59 = vperm.slane %v462_v49, 1  ;;  %v1085_v60 = vpack.c.b16 %v1049_v45, %v1047_v44 }
  0x46   : > { %v626_v55 = vperm.slane %v624_v30, 0  ;;  %v839_v61 = vmax.f32 %v679_v37, 0.0  ;;  %v840_v62 = vmax.f32 %v680_v46, 0.0  ;;  %v841_v63 = vmax.f32 %v681_v47, 0.0 }
  0x47   : > { %v663_v0 = vunpack.c.l.bf16 %v622_v53  ;;  %v532_v3 = vpack.i.b16 %v481_v56, %v481_v56  ;;  %v536_v5 = vpack.i.b16 %v482_v59, %v482_v59  ;;  %v842_v57 = vmax.f32 %v682_v6, 0.0 }
  0x48   : > { %2210 = vmatpush.bf16.msrb.mxu3 %v2559_v19  ;;  %v664_v1 = vunpack.c.l.bf16 %v626_v55  ;;  %v505_v58 = vperm.slane %v474_v52, 0  ;;  %v506_v11 = vperm.slane %v474_v52, 1  ;;  %v423_v19 = vsel %vm422_vm1, %v2541_v7, %v2547_v9 }
  0x49   : > { %v727_v12 = vadd.f32 %v2561_v20, %v663_v0  ;;  %v729_v40 = vadd.f32 %v2568_v27, %v663_v0  ;;  %v534_v2 = vperm.slane %v532_v3, 0  ;;  %v538_v16 = vperm.slane %v536_v5, 0 }
  0x4a   : > { %v728_v13 = vadd.f32 %v2563_v21, %v664_v1  ;;  %v730_v14 = vadd.f32 %v2570_v28, %v664_v1  ;;  %v628_v17 = vpack.i.b16 %v505_v58, %v505_v58  ;;  %v632_v18 = vpack.i.b16 %v506_v11, %v506_v11 }
  0x4b   : > { %1232 = vmatmul.bf16.gmra.mxu0 %v1061_v50  ;;  %v889_v23 = vmax.f32 %v729_v40, 0.0  ;;  %v899_v25 = vpack.c.bf16 %v840_v62, %v839_v61  ;;  %v900_v33 = vpack.c.bf16 %v842_v57, %v841_v63  ;;  %v425_v4 = vrot.slane %v423_v19, 2 }
  0x4c   : > { %2211 = vmatpush.bf16.msrb.mxu3 %v2575_v36  ;;  %1321 = vmatmul.bf16.gmra.mxu1 %v1062_v51  ;;  %v887_v36 = vmax.f32 %v727_v12, 0.0  ;;  %v888_v22 = vmax.f32 %v728_v13, 0.0  ;;  %v890_v24 = vmax.f32 %v730_v14, 0.0  ;;  %v630_v26 = vperm.slane %v628_v17, 0 }
  0x4d   : > { %1292 = vmatmul.bf16.gmra.mxu3 %v1085_v60  ;;  %v634_v32 = vperm.slane %v632_v18, 0  ;;  %v641_v37 = vunpack.c.l.bf16 %v534_v2  ;;  %v642_v38 = vunpack.c.l.bf16 %v538_v16  ;;  %v1003_v39 = vunpack.c.l.b16 %v899_v25 }
  0x4e   : > { %v2642_v34 = vpack.c.bf16 %v888_v22, %v887_v36  ;;  %v2644_v35 = vpack.c.bf16 %v890_v24, %v889_v23  ;;  %v665_v44 = vunpack.c.l.bf16 %v630_v26  ;;  %v1005_v46 = vunpack.c.l.b16 %v900_v33 }
  0x4f   : > { %v666_v45 = vunpack.c.l.bf16 %v634_v32  ;;  %v2065_v48 = vpack.i.b16 %v425_v4, %v425_v4  ;;  %v1004_v30 = vunpack.c.h.b16 %v899_v25  ;;  %v1006_v49 = vunpack.c.h.b16 %v900_v33 }
  0x50   : > { %2212 = vmatpush.bf16.msrb.mxu3 %v2582_v54  ;;  %v1051_v47 = vunpack.c.l.b16 %v2642_v34  ;;  %v1053_v54 = vunpack.c.l.b16 %v2644_v35  ;;  %v683_v50 = vadd.f32 %v2561_v20, %v641_v37  ;;  %v684_v51 = vadd.f32 %v2563_v21, %v642_v38 }
  0x51   : > { %v685_v6 = vadd.f32 %v2568_v27, %v641_v37  ;;  %v686_v52 = vadd.f32 %v2570_v28, %v642_v38  ;;  %v732_v53 = vadd.f32 %v2563_v21, %v666_v45  ;;  %v733_v55 = vadd.f32 %v2568_v27, %v665_v44 }
  0x52   : > { %v734_v56 = vadd.f32 %v2570_v28, %v666_v45  ;;  %v1063_v59 = vpack.c.b16 %v1005_v46, %v1003_v39  ;;  %v1087_v60 = vpack.c.b16 %v1053_v54, %v1051_v47  ;;  %v483_v61 = vperm.slane %v2065_v48, 0 }
  0x53   : > { %v484_v62 = vperm.slane %v2065_v48, 1  ;;  %v1064_v63 = vpack.c.b16 %v1006_v49, %v1004_v30  ;;  %v843_v0 = vmax.f32 %v683_v50, 0.0  ;;  %v844_v1 = vmax.f32 %v684_v51, 0.0 }
  0x54   : > { %2213 = vmatpush.bf16.msrb.mxu3 %v2589_v15  ;;  %v731_v15 = vadd.f32 %v2561_v20, %v665_v44  ;;  %v845_v3 = vmax.f32 %v685_v6, 0.0  ;;  %v846_v5 = vmax.f32 %v686_v52, 0.0  ;;  %v1044_v57 = vunpack.c.h.b16 %v2600_v42 }
  0x55   : > { %v892_v11 = vmax.f32 %v732_v53, 0.0  ;;  %v893_v19 = vmax.f32 %v733_v55, 0.0  ;;  %v894_v12 = vmax.f32 %v734_v56, 0.0  ;;  %v540_v13 = vpack.i.b16 %v483_v61, %v483_v61 }
  0x56   : > { %v891_v58 = vmax.f32 %v731_v15, 0.0  ;;  %v544_v40 = vpack.i.b16 %v484_v62, %v484_v62  ;;  %v901_v2 = vpack.c.bf16 %v844_v1, %v843_v0  ;;  %v902_v16 = vpack.c.bf16 %v846_v5, %v845_v3 }
  0x57   : > { %v2664_v18 = vpack.c.bf16 %v894_v12, %v893_v19  ;;  %v448_v42 = vunpack.i.h.s16 %v425_v4  ;;  %v542_v36 = vperm.slane %v540_v13, 0  ;;  %v1048_v49 = vunpack.c.h.b16 %v2620_v29 }
  0x58   : > { %2214 = vmatpush.bf16.msrb.mxu3 %v2598_v41  ;;  %v1046_v41 = vunpack.c.h.b16 %v2602_v43  ;;  %v2662_v17 = vpack.c.bf16 %v892_v11, %v891_v58  ;;  %v546_v43 = vperm.slane %v544_v40, 0  ;;  %v1007_v22 = vunpack.c.l.b16 %v901_v2 }
  0x59   : > { %v1009_v23 = vunpack.c.l.b16 %v902_v16  ;;  %v1057_v25 = vunpack.c.l.b16 %v2664_v18  ;;  %v464_v26 = vpack.i.b16 %v448_v42, %v448_v42  ;;  %v643_v32 = vunpack.c.l.bf16 %v542_v36 }
  0x5a   : > { %v2660_v14 = vpack.c.b16 %v1046_v41, %v1044_v57  ;;  %v1055_v24 = vunpack.c.l.b16 %v2662_v17  ;;  %v644_v33 = vunpack.c.l.bf16 %v546_v43  ;;  %v1008_v37 = vunpack.c.h.b16 %v901_v2 }
  0x5b   : > { %1237 = vmatmul.bf16.gmra.mxu0 %v1063_v59  ;;  %v1010_v38 = vunpack.c.h.b16 %v902_v16  ;;  %v1065_v39 = vpack.c.b16 %v1009_v23, %v1007_v22  ;;  %v485_v45 = vperm.slane %v464_v26, 0  ;;  %v486_v46 = vperm.slane %v464_v26, 1  ;;  %v2197_v26 = vld [vmem:[%s3084_s4 + $0x38] sm:$0xff] }
  0x5c   : > { %1326 = vmatmul.bf16.gmra.mxu1 %v1064_v63  ;;  %v1089_v44 = vpack.c.b16 %v1057_v25, %v1055_v24  ;;  %v687_v47 = vadd.f32 %v2561_v20, %v643_v32  ;;  %v688_v4 = vadd.f32 %v2563_v21, %v644_v33  ;;  %v689_v54 = vadd.f32 %v2568_v27, %v643_v32 }
  0x5d   : > { %1297 = vmatmul.bf16.gmra.mxu3 %v1087_v60  ;;  %v690_v48 = vadd.f32 %v2570_v28, %v644_v33  ;;  %v1066_v30 = vpack.c.b16 %v1010_v38, %v1008_v37  ;;  %v1050_v50 = vunpack.c.h.b16 %v2622_v31  ;;  %v548_v51 = vpack.i.b16 %v485_v45, %v485_v45  ;;  %1513 = vmatpush.bf16.msra.mxu2 %v2197_v26 }
  0x5e   : > { %v552_v6 = vpack.i.b16 %v486_v46, %v486_v46  ;;  %v427_v15 = vsel %vm426_vm3, %v2541_v7, %v2547_v9  ;;  %v847_v53 = vmax.f32 %v687_v47, 0.0  ;;  %v848_v55 = vmax.f32 %v688_v4, 0.0  ;;  %2215 = vmatpush.bf16.msra.mxu3 %v2197_v26 }
  0x5f   : > { %v2674_v52 = vpack.c.b16 %v1050_v50, %v1048_v49  ;;  %v849_v56 = vmax.f32 %v689_v54, 0.0  ;;  %v850_v59 = vmax.f32 %v690_v48, 0.0  ;;  %v429_v60 = vrot.slane %v427_v15, 3 }
  0x60   : > { %v550_v61 = vperm.slane %v548_v51, 0  ;;  %v903_v29 = vpack.c.bf16 %v848_v55, %v847_v53  ;;  %v554_v31 = vperm.slane %v552_v6, 0  ;;  %v1052_v2 = vunpack.c.h.b16 %v2642_v34 }
  0x61   : > { %v904_v62 = vpack.c.bf16 %v850_v59, %v849_v56  ;;  %v2066_v63 = vpack.i.b16 %v429_v60, %v429_v60  ;;  %v1054_v16 = vunpack.c.h.b16 %v2644_v35  ;;  %v450_v37 = vunpack.i.h.s16 %v429_v60 }
  0x62   : > { %v645_v0 = vunpack.c.l.bf16 %v550_v61  ;;  %v1011_v1 = vunpack.c.l.b16 %v903_v29  ;;  %v646_v5 = vunpack.c.l.bf16 %v554_v31  ;;  %v1012_v57 = vunpack.c.h.b16 %v903_v29  ;;  %v2196_v31 = vld [vmem:[%s3084_s4 + $0x30] sm:$0xff] }
  0x63   : > { %v1013_v3 = vunpack.c.l.b16 %v904_v62  ;;  %v1014_v41 = vunpack.c.h.b16 %v904_v62  ;;  %v487_v7 = vperm.slane %v2066_v63, 0  ;;  %v488_v58 = vperm.slane %v2066_v63, 1  ;;  %1514 = vmatpush.bf16.msra.mxu2 %v2196_v31  ;;  %2216 = vmatpush.bf16.msra.mxu3 %v2196_v31 }
  0x64   : > { %v691_v9 = vadd.f32 %v2561_v20, %v645_v0  ;;  %v692_v19 = vadd.f32 %v2563_v21, %v646_v5  ;;  %v693_v12 = vadd.f32 %v2568_v27, %v645_v0  ;;  %v694_v13 = vadd.f32 %v2570_v28, %v646_v5 }
  0x65   : > { %v1067_v11 = vpack.c.b16 %v1013_v3, %v1011_v1  ;;  %v1068_v40 = vpack.c.b16 %v1014_v41, %v1012_v57  ;;  %v556_v42 = vpack.i.b16 %v487_v7, %v487_v7  ;;  %v560_v43 = vpack.i.b16 %v488_v58, %v488_v58  ;;  %v2194_v41 = vld [vmem:[%s3084_s4 + $0x20] sm:$0xff] }
  0x66   : > { %v851_v36 = vmax.f32 %v691_v9, 0.0  ;;  %v852_v22 = vmax.f32 %v692_v19, 0.0  ;;  %v853_v23 = vmax.f32 %v693_v12, 0.0  ;;  %v854_v24 = vmax.f32 %v694_v13, 0.0 }
  0x67   : > { %v2686_v25 = vpack.c.b16 %v1054_v16, %v1052_v2  ;;  %v558_v32 = vperm.slane %v556_v42, 0  ;;  %v562_v34 = vperm.slane %v560_v43, 0  ;;  %v466_v45 = vpack.i.b16 %v450_v37, %v450_v37  ;;  %v2193_v43 = vld [vmem:[%s3084_s4 + $0x18] sm:$0xff] }
  0x68   : > { %v905_v35 = vpack.c.bf16 %v852_v22, %v851_v36  ;;  %v906_v33 = vpack.c.bf16 %v854_v24, %v853_v23  ;;  %v1056_v15 = vunpack.c.h.b16 %v2662_v17  ;;  %v1058_v53 = vunpack.c.h.b16 %v2664_v18  ;;  %v2195_v18 = vld [vmem:[%s3084_s4 + $0x28] sm:$0xff] }
  0x69   : > { %v647_v38 = vunpack.c.l.bf16 %v558_v32  ;;  %v489_v50 = vperm.slane %v466_v45, 0  ;;  %v490_v51 = vperm.slane %v466_v45, 1  ;;  %v432_v0 = vsel %vm413_vm0, %v2543_v8, %v2550_v10  ;;  %1515 = vmatpush.bf16.msra.mxu2 %v2195_v18  ;;  %2217 = vmatpush.bf16.msra.mxu3 %v2195_v18 }
  0x6a   : > { %v1016_v46 = vunpack.c.h.b16 %v905_v35  ;;  %v1018_v47 = vunpack.c.h.b16 %v906_v33  ;;  %v2697_v61 = vpack.c.b16 %v1058_v53, %v1056_v15  ;;  %v2067_v3 = vpack.i.b16 %v432_v0, %v432_v0 }
  0x6b   : > { %1242 = vmatmul.bf16.gmra.mxu0 %v1065_v39  ;;  %v648_v39 = vunpack.c.l.bf16 %v562_v34  ;;  %v695_v4 = vadd.f32 %v2561_v20, %v647_v38  ;;  %v697_v48 = vadd.f32 %v2568_v27, %v647_v38  ;;  %v564_v29 = vpack.i.b16 %v489_v50, %v489_v50 }
  0x6c   : > { %1331 = vmatmul.bf16.gmra.mxu1 %v1066_v30  ;;  %v1070_v6 = vpack.c.b16 %v1018_v47, %v1016_v46  ;;  %v568_v62 = vpack.i.b16 %v490_v51, %v490_v51  ;;  %v491_v19 = vperm.slane %v2067_v3, 0  ;;  %v492_v13 = vperm.slane %v2067_v3, 1 }
  0x6d   : > { %1302 = vmatmul.bf16.gmra.mxu3 %v1089_v44  ;;  %v1017_v44 = vunpack.c.l.b16 %v906_v33  ;;  %v696_v54 = vadd.f32 %v2563_v21, %v648_v39  ;;  %v698_v30 = vadd.f32 %v2570_v28, %v648_v39  ;;  %v855_v55 = vmax.f32 %v695_v4, 0.0  ;;  %1516 = vmatpush.bf16.msra.mxu2 %v2194_v41  ;;  %v2192_v33 = vld [vmem:[%s3084_s4 + $0x10] sm:$0xff] }
  0x6e   : > { %v857_v59 = vmax.f32 %v697_v48, 0.0  ;;  %v570_v1 = vperm.slane %v568_v62, 0  ;;  %2218 = vmatpush.bf16.msra.mxu3 %v2194_v41  ;;  %v572_v22 = vpack.i.b16 %v491_v19, %v491_v19  ;;  %v576_v23 = vpack.i.b16 %v492_v13, %v492_v13 }
  0x6f   : > { %v856_v56 = vmax.f32 %v696_v54, 0.0  ;;  %v858_v60 = vmax.f32 %v698_v30, 0.0  ;;  %v434_v31 = vsel %vm418_vm2, %v2543_v8, %v2550_v10 }
  0x70   : > { %v650_v9 = vunpack.c.l.bf16 %v570_v1  ;;  %v578_v37 = vperm.slane %v576_v23, 0  ;;  %v436_v18 = vrot.slane %v434_v31, 1 }
  0x71   : > { %v907_v63 = vpack.c.bf16 %v856_v56, %v855_v55  ;;  %v908_v17 = vpack.c.bf16 %v858_v60, %v857_v59  ;;  %1517 = vmatpush.bf16.msra.mxu2 %v2193_v43 }
  0x72   : > { %v700_v2 = vadd.f32 %v2563_v21, %v650_v9  ;;  %v702_v42 = vadd.f32 %v2570_v28, %v650_v9  ;;  %2219 = vmatpush.bf16.msra.mxu3 %v2193_v43  ;;  %v652_v45 = vunpack.c.l.bf16 %v578_v37 }
  0x73   : > { %v1019_v5 = vunpack.c.l.b16 %v907_v63  ;;  %v1021_v57 = vunpack.c.l.b16 %v908_v17  ;;  %v1020_v58 = vunpack.c.h.b16 %v907_v63 }
  0x74   : > { %v860_v26 = vmax.f32 %v700_v2, 0.0  ;;  %v862_v34 = vmax.f32 %v702_v42, 0.0  ;;  %v704_v50 = vadd.f32 %v2563_v21, %v652_v45  ;;  %v2744_v42 = vld [vmem:[%s3083_s3] ss:$0 sm:$0xff] }
  0x75   : > { %v1071_v12 = vpack.c.b16 %v1021_v57, %v1019_v5  ;;  %1518 = vmatpush.bf16.msra.mxu2 %v2192_v33  ;;  %v2068_v5 = vpack.i.b16 %v436_v18, %v436_v18 }
  0x76   : > { %2220 = vmatpush.bf16.msra.mxu3 %v2192_v33  ;;  %v864_v60 = vmax.f32 %v704_v50, 0.0 }
  0x77   : > { %v495_v19 = vperm.slane %v2068_v5, 0  ;;  %v496_v10 = vperm.slane %v2068_v5, 1 }
  0x79   : > { %v588_v43 = vpack.i.b16 %v495_v19, %v495_v19 }
  0x7b   : > { %1247 = vmatmul.bf16.gmra.mxu0 %v1067_v11  ;;  %v1022_v11 = vunpack.c.h.b16 %v908_v17 }
  0x7c   : > { %1336 = vmatmul.bf16.gmra.mxu1 %v1068_v40 }
  0x7d   : > { %1376 = vmatmul.bf16.vlgmr.msrb.gmra.mxu3 %v2660_v14  ;;  %v1015_v14 = vunpack.c.l.b16 %v905_v35  ;;  %v1072_v36 = vpack.c.b16 %v1022_v11, %v1020_v58  ;;  %v574_v35 = vperm.slane %v572_v22, 0  ;;  %v592_v22 = vpack.i.b16 %v496_v10, %v496_v10 }
  0x7f   : > { %v1069_v49 = vpack.c.b16 %v1017_v44, %v1015_v14  ;;  %v452_v14 = vunpack.i.h.s16 %v432_v0  ;;  %v651_v44 = vunpack.c.l.bf16 %v574_v35  ;;  %v590_v35 = vperm.slane %v588_v43, 0 }
  0x80   : > { %v594_v37 = vperm.slane %v592_v22, 0 }
  0x81   : > { %v468_v4 = vpack.i.b16 %v452_v14, %v452_v14  ;;  %v703_v30 = vadd.f32 %v2561_v20, %v651_v44  ;;  %v705_v51 = vadd.f32 %v2568_v27, %v651_v44 }
  0x83   : > { %v493_v53 = vperm.slane %v468_v4, 0  ;;  %v494_v55 = vperm.slane %v468_v4, 1  ;;  %v863_v59 = vmax.f32 %v703_v30, 0.0  ;;  %v656_v4 = vunpack.c.l.bf16 %v594_v37 }
  0x85   : > { %v580_v63 = vpack.i.b16 %v493_v53, %v493_v53  ;;  %v584_v17 = vpack.i.b16 %v494_v55, %v494_v55  ;;  %v911_v0 = vpack.c.bf16 %v864_v60, %v863_v59  ;;  %v714_v60 = vadd.f32 %v2570_v28, %v656_v4 }
  0x87   : > { %v582_v1 = vperm.slane %v580_v63, 0  ;;  %v586_v3 = vperm.slane %v584_v17, 0  ;;  %v1027_v57 = vunpack.c.l.b16 %v911_v0  ;;  %v1028_v58 = vunpack.c.h.b16 %v911_v0 }
  0x88   : > { %v874_v5 = vmax.f32 %v714_v60, 0.0 }
  0x89   : > { %v654_v9 = vunpack.c.l.bf16 %v586_v3 }
  0x8b   : > { %1252 = vmatmul.bf16.gmra.mxu0 %v1069_v49  ;;  %v2190_v49 = vld [vmem:[%s3084_s4] sm:$0xff] }
  0x8c   : > { %1341 = vmatmul.bf16.gmra.mxu1 %v1070_v6  ;;  %v706_v6 = vadd.f32 %v2570_v28, %v652_v45 }
  0x8d   : > { %1381 = vmatmul.bf16.gmra.mxu3 %v2674_v52  ;;  %v566_v52 = vperm.slane %v564_v29, 0  ;;  %v865_v29 = vmax.f32 %v705_v51, 0.0 }
  0x8e   : > { %v866_v62 = vmax.f32 %v706_v6, 0.0 }
  0x8f   : > { %v649_v7 = vunpack.c.l.bf16 %v566_v52 }
  0x90   : > { %v912_v52 = vpack.c.bf16 %v866_v62, %v865_v29 }
  0x91   : > { %v699_v40 = vadd.f32 %v2561_v20, %v649_v7  ;;  %v701_v16 = vadd.f32 %v2568_v27, %v649_v7  ;;  %v653_v7 = vunpack.c.l.bf16 %v582_v1 }
  0x92   : > { %v1029_v41 = vunpack.c.l.b16 %v912_v52  ;;  %v1030_v11 = vunpack.c.h.b16 %v912_v52 }
  0x93   : > { %v859_v24 = vmax.f32 %v699_v40, 0.0  ;;  %v861_v32 = vmax.f32 %v701_v16, 0.0  ;;  %v709_v13 = vadd.f32 %v2568_v27, %v653_v7  ;;  %v710_v40 = vadd.f32 %v2570_v28, %v654_v9 }
  0x94   : > { %v1075_v8 = vpack.c.b16 %v1029_v41, %v1027_v57  ;;  %v1076_v16 = vpack.c.b16 %v1030_v11, %v1028_v58 }
  0x95   : > { %v909_v38 = vpack.c.bf16 %v860_v26, %v859_v24  ;;  %v910_v39 = vpack.c.bf16 %v862_v34, %v861_v32  ;;  %v869_v26 = vmax.f32 %v709_v13, 0.0  ;;  %v870_v32 = vmax.f32 %v710_v40, 0.0 }
  0x97   : > { %v1023_v46 = vunpack.c.l.b16 %v909_v38  ;;  %v1025_v47 = vunpack.c.l.b16 %v910_v39  ;;  %v1024_v54 = vunpack.c.h.b16 %v909_v38  ;;  %v1026_v48 = vunpack.c.h.b16 %v910_v39 }
  0x98   : > { %v454_v38 = vunpack.i.h.s16 %v436_v18  ;;  %v914_v14 = vpack.c.bf16 %v870_v32, %v869_v26 }
  0x99   : > { %v1073_v15 = vpack.c.b16 %v1025_v47, %v1023_v46  ;;  %v1074_v56 = vpack.c.b16 %v1026_v48, %v1024_v54  ;;  %v655_v47 = vunpack.c.l.bf16 %v590_v35 }
  0x9a   : > { %v470_v54 = vpack.i.b16 %v454_v38, %v454_v38  ;;  %v1034_v51 = vunpack.c.h.b16 %v914_v14 }
  0x9b   : > { %1257 = vmatmul.bf16.gmra.mxu0 %v1071_v12  ;;  %v708_v12 = vadd.f32 %v2563_v21, %v654_v9  ;;  %v711_v53 = vadd.f32 %v2561_v20, %v655_v47  ;;  %v713_v59 = vadd.f32 %v2568_v27, %v655_v47 }
  0x9c   : > { %1346 = vmatmul.bf16.gmra.mxu1 %v1072_v36  ;;  %v497_v29 = vperm.slane %v470_v54, 0  ;;  %v498_v63 = vperm.slane %v470_v54, 1 }
  0x9d   : > { %1386 = vmatmul.bf16.gmra.mxu3 %v2686_v25  ;;  %v2191_v25 = vld [vmem:[%s3084_s4 + $0x8] sm:$0xff]  ;;  %v868_v24 = vmax.f32 %v708_v12, 0.0  ;;  %v871_v52 = vmax.f32 %v711_v53, 0.0  ;;  %v873_v3 = vmax.f32 %v713_v59, 0.0 }
  0x9e   : > { %1519 = vmatpush.bf16.msra.mxu2 %v2191_v25  ;;  %2221 = vmatpush.bf16.msra.mxu3 %v2191_v25  ;;  %v596_v57 = vpack.i.b16 %v497_v29, %v497_v29  ;;  %v600_v41 = vpack.i.b16 %v498_v63, %v498_v63 }
  0x9f   : > { %v916_v11 = vpack.c.bf16 %v874_v5, %v873_v3 }
  0xa0   : > { %v598_v19 = vperm.slane %v596_v57, 0 }
  0xa2   : > { %1520 = vmatpush.bf16.msra.mxu2 %v2190_v49  ;;  %2222 = vmatpush.bf16.msra.mxu3 %v2190_v49  ;;  %v1033_v49 = vunpack.c.l.b16 %v914_v14 }
  0xab   : > { %1262 = vmatmul.bf16.gmra.mxu0 %v1073_v15 }
  0xac   : > { %1351 = vmatmul.bf16.gmra.mxu1 %v1074_v56  ;;  %v712_v56 = vadd.f32 %v2563_v21, %v656_v4 }
  0xad   : > { %1391 = vmatmul.bf16.gmra.mxu3 %v2697_v61  ;;  %v707_v61 = vadd.f32 %v2561_v20, %v653_v7 }
  0xae   : > { %v872_v1 = vmax.f32 %v712_v56, 0.0 }
  0xaf   : > { %v867_v23 = vmax.f32 %v707_v61, 0.0 }
  0xb0   : > { %v915_v58 = vpack.c.bf16 %v872_v1, %v871_v52 }
  0xb1   : > { %v913_v39 = vpack.c.bf16 %v868_v24, %v867_v23  ;;  %v1038_v23 = vunpack.c.h.b16 %v916_v11 }
  0xb2   : > { %v1035_v40 = vunpack.c.l.b16 %v915_v58  ;;  %v1036_v22 = vunpack.c.h.b16 %v915_v58 }
  0xb3   : > { %v1031_v30 = vunpack.c.l.b16 %v913_v39  ;;  %v1032_v50 = vunpack.c.h.b16 %v913_v39 }
  0xb5   : > { %v1077_v31 = vpack.c.b16 %v1033_v49, %v1031_v30  ;;  %v1078_v18 = vpack.c.b16 %v1034_v51, %v1032_v50 }
  0xb8   : > { %v1228_v2 = vpop.f32.mrf.mxu0 }
  0xb9   : > { %v1317_v36 = vpop.f32.mrf.mxu1  ;;  %v1229_v34 = vadd.f32 %v2744_v42, %v1228_v2  ;;  %v1037_v2 = vunpack.c.l.b16 %v916_v11 }
  0xbb   : > { %1267 = vmatmul.bf16.gmra.mxu0 %v1075_v8  ;;  %v1318_v25 = vadd.f32 %v1317_v36, %v1229_v34  ;;  %v602_v8 = vperm.slane %v600_v41, 0  ;;  %v1079_v34 = vpack.c.b16 %v1037_v2, %v1035_v40 }
  0xbc   : > { %1356 = vmatmul.bf16.gmra.mxu1 %v1076_v16  ;;  %v657_v16 = vunpack.c.l.bf16 %v598_v19 }
  0xbd   : > { %v1397_v6 = vmax.f32 %v1318_v25, 0.0  ;;  %v658_v43 = vunpack.c.l.bf16 %v602_v8  ;;  %v1080_v25 = vpack.c.b16 %v1038_v23, %v1036_v22 }
  0xbe   : > { %v715_v35 = vadd.f32 %v2561_v20, %v657_v16  ;;  %v717_v39 = vadd.f32 %v2568_v27, %v657_v16 }
  0xbf   : > { %v716_v38 = vadd.f32 %v2563_v21, %v658_v43  ;;  %v718_v14 = vadd.f32 %v2570_v28, %v658_v43 }
  0xc0   : > { %v2747_v33 = vpop.f32.mrf.mxu3  ;;  %v1230_v44 = vpop.f32.mrf.mxu0  ;;  %v877_v4 = vmax.f32 %v717_v39, 0.0 }
  0xc1   : > { %v1231_v45 = vadd.f32 %v2744_v42, %v1230_v44  ;;  %v1319_v46 = vpop.f32.mrf.mxu1  ;;  %v876_v47 = vmax.f32 %v716_v38, 0.0  ;;  %v878_v54 = vmax.f32 %v718_v14, 0.0 }
  0xc3   : > { %v1320_v48 = vadd.f32 %v1319_v46, %v1231_v45  ;;  %v875_v46 = vmax.f32 %v715_v35, 0.0  ;;  %v918_v21 = vpack.c.bf16 %v878_v54, %v877_v4 }
  0xc5   : > { %v1398_v15 = vmax.f32 %v1320_v48, 0.0  ;;  %v917_v30 = vpack.c.bf16 %v876_v47, %v875_v46  ;;  %v1042_v56 = vunpack.c.h.b16 %v918_v21 }
  0xc7   : > { %v1429_v62 = vpack.c.bf16 %v1398_v15, %v1397_v6  ;;  %v1039_v6 = vunpack.c.l.b16 %v917_v30  ;;  %v1041_v15 = vunpack.c.l.b16 %v918_v21  ;;  %v1040_v53 = vunpack.c.h.b16 %v917_v30 }
  0xc8   : > { %v2751_v55 = vpop.f32.mrf.mxu3  ;;  %v1233_v17 = vpop.f32.mrf.mxu0 }
  0xc9   : > { %v1322_v0 = vpop.f32.mrf.mxu1  ;;  %1521 = vmatmul.bf16.vlgmr.msra.gmra.mxu2 %v1429_v62  ;;  %v1234_v7 = vadd.f32 %v2744_v42, %v1233_v17  ;;  %v1082_v17 = vpack.c.b16 %v1042_v56, %v1040_v53  ;;  %v1291_v22 = vadd.f32 %v2744_v42, %v2751_v55 }
  0xcb   : > { %1272 = vmatmul.bf16.gmra.mxu0 %v1077_v31  ;;  %v1323_v61 = vadd.f32 %v1322_v0, %v1234_v7  ;;  %v1081_v31 = vpack.c.b16 %v1041_v15, %v1039_v6 }
  0xcc   : > { %1361 = vmatmul.bf16.gmra.mxu1 %v1078_v18 }
  0xcd   : > { %v1399_v24 = vmax.f32 %v1323_v61, 0.0 }
  0xd0   : > { %v2757_v9 = vpop.f32.mrf.mxu3  ;;  %v1235_v10 = vpop.f32.mrf.mxu0 }
  0xd1   : > { %v1236_v12 = vadd.f32 %v2744_v42, %v1235_v10  ;;  %v1324_v13 = vpop.f32.mrf.mxu1  ;;  %v1294_v54 = vadd.f32 %v2744_v42, %v2757_v9 }
  0xd3   : > { %v1325_v36 = vadd.f32 %v1324_v13, %v1236_v12 }
  0xd5   : > { %v1400_v26 = vmax.f32 %v1325_v36, 0.0  ;;  %v1289_v36 = vadd.f32 %v2744_v42, %v2747_v33 }
  0xd7   : > { %v1430_v37 = vpack.c.bf16 %v1400_v26, %v1399_v24 }
  0xd8   : > { %v2760_v32 = vpop.f32.mrf.mxu3  ;;  %v1238_v44 = vpop.f32.mrf.mxu0 }
  0xd9   : > { %v1327_v45 = vpop.f32.mrf.mxu1  ;;  %1526 = vmatmul.bf16.gmra.mxu2 %v1430_v37  ;;  %v1239_v48 = vadd.f32 %v2744_v42, %v1238_v44  ;;  %v1296_v30 = vadd.f32 %v2744_v42, %v2760_v32 }
  0xdb   : > { %1277 = vmatmul.bf16.gmra.mxu0 %v1079_v34  ;;  %v1328_v27 = vadd.f32 %v1327_v45, %v1239_v48 }
  0xdc   : > { %1366 = vmatmul.bf16.gmra.mxu1 %v1080_v25 }
  0xdd   : > { %v1401_v59 = vmax.f32 %v1328_v27, 0.0 }
  0xe0   : > { %v2767_v20 = vpop.f32.mrf.mxu3  ;;  %v1240_v49 = vpop.f32.mrf.mxu0 }
  0xe1   : > { %v1241_v28 = vadd.f32 %v2744_v42, %v1240_v49  ;;  %v1329_v50 = vpop.f32.mrf.mxu1 }
  0xe3   : > { %v1330_v51 = vadd.f32 %v1329_v50, %v1241_v28 }
  0xe5   : > { %v1402_v60 = vmax.f32 %v1330_v51, 0.0 }
  0xe7   : > { %v1431_v62 = vpack.c.bf16 %v1402_v60, %v1401_v59  ;;  %v2297_v59 = vld [vmem:[#allocation2] ss:$0 sm:$0xff]  ;;  %v2417_v60 = vmov 0  }
  0xe8   : > { %v2770_v29 = vpop.f32.mrf.mxu3  ;;  %v1243_v63 = vpop.f32.mrf.mxu0  ;;  %2294 = vset.pattern.permute.xlu1 %v2417_v60  ;;  %2295 = vset.pattern.permute.xlu0 %v2417_v60 }
  0xe9   : > { %v1332_v18 = vpop.f32.mrf.mxu1  ;;  %1531 = vmatmul.bf16.gmra.mxu2 %v1431_v62  ;;  %v1244_v0 = vadd.f32 %v2744_v42, %v1243_v63  ;;  %1771 = vperm.xlu1 %2294, %v2297_v59  }
  0xeb   : > { %1282 = vmatmul.bf16.gmra.mxu0 %v1081_v31  ;;  %v1333_v3 = vadd.f32 %v1332_v18, %v1244_v0  ;;  %v1299_v0 = vadd.f32 %v2744_v42, %v2767_v20 }
  0xec   : > { %1371 = vmatmul.bf16.gmra.mxu1 %v1082_v17 }
  0xed   : > { %v1403_v7 = vmax.f32 %v1333_v3, 0.0  ;;  %v1301_v3 = vadd.f32 %v2744_v42, %v2770_v29 }
  0xf0   : > { %v2773_v52 = vpop.f32.mrf.mxu3  ;;  %v1245_v1 = vpop.f32.mrf.mxu0 }
  0xf1   : > { %v1246_v5 = vadd.f32 %v2744_v42, %v1245_v1  ;;  %v1334_v57 = vpop.f32.mrf.mxu1 }
  0xf3   : > { %v1335_v41 = vadd.f32 %v1334_v57, %v1246_v5 }
  0xf5   : > { %v1404_v58 = vmax.f32 %v1335_v41, 0.0 }
  0xf7   : > { %v1432_v19 = vpack.c.bf16 %v1404_v58, %v1403_v7 }
  0xf8   : > { %v2776_v11 = vpop.f32.mrf.mxu3  ;;  %v1248_v8 = vpop.f32.mrf.mxu0 }
  0xf9   : > { %v1337_v10 = vpop.f32.mrf.mxu1  ;;  %1536 = vmatmul.bf16.gmra.mxu2 %v1432_v19  ;;  %v1249_v61 = vadd.f32 %v2744_v42, %v1248_v8 }
  0xfb   : > { %v1338_v40 = vadd.f32 %v1337_v10, %v1249_v61 }
  0xfd   : > { %v1405_v23 = vmax.f32 %v1338_v40, 0.0 }
 0x100   : > { %v1377_v12 = vpop.f32.mrf.mxu3  ;;  %v1250_v13 = vpop.f32.mrf.mxu0 }
 0x101   : > { %v1251_v2 = vadd.f32 %v2744_v42, %v1250_v13  ;;  %v1339_v16 = vpop.f32.mrf.mxu1  ;;  %v1378_v24 = vadd.f32 %v1377_v12, %v1289_v36 }
 0x103   : > { %v1340_v43 = vadd.f32 %v1339_v16, %v1251_v2  ;;  %v1421_v39 = vmax.f32 %v1378_v24, 0.0 }
 0x105   : > { %v1406_v26 = vmax.f32 %v1340_v43, 0.0  ;;  %v1304_v43 = vadd.f32 %v2744_v42, %v2773_v52 }
 0x107   : > { %v1433_v37 = vpack.c.bf16 %v1406_v26, %v1405_v23  ;;  %v1306_v23 = vadd.f32 %v2744_v42, %v2776_v11 }
 0x108   : > { %v1379_v34 = vpop.f32.mrf.mxu3  ;;  %v1253_v38 = vpop.f32.mrf.mxu0 }
 0x109   : > { %v1380_v35 = vadd.f32 %v1379_v34, %v1291_v22  ;;  %v1342_v44 = vpop.f32.mrf.mxu1  ;;  %1541 = vmatmul.bf16.gmra.mxu2 %v1433_v37  ;;  %v1254_v45 = vadd.f32 %v2744_v42, %v1253_v38 }
 0x10b   : > { %v1422_v14 = vmax.f32 %v1380_v35, 0.0  ;;  %v1343_v47 = vadd.f32 %v1342_v44, %v1254_v45 }
 0x10d   : > { %v1441_v25 = vpack.c.bf16 %v1422_v14, %v1421_v39  ;;  %v1407_v21 = vmax.f32 %v1343_v47, 0.0 }
 0x10f   : > { %1581 = vmatmul.bf16.vlgmr.msra.gmra.mxu3 %v1441_v25 }
 0x110   : > { %v1382_v33 = vpop.f32.mrf.mxu3  ;;  %v1255_v46 = vpop.f32.mrf.mxu0 }
 0x111   : > { %v1256_v55 = vadd.f32 %v2744_v42, %v1255_v46  ;;  %v1344_v4 = vpop.f32.mrf.mxu1  ;;  %v1383_v49 = vadd.f32 %v1382_v33, %v1294_v54 }
 0x113   : > { %v1345_v48 = vadd.f32 %v1344_v4, %v1256_v55  ;;  %v1423_v15 = vmax.f32 %v1383_v49, 0.0  ;;  %v2807_v49 = vld [vmem:[%s3085_s5] ss:$0 sm:$0xff] }
 0x115   : > { %v1408_v27 = vmax.f32 %v1345_v48, 0.0 }
 0x117   : > { %v1434_v51 = vpack.c.bf16 %v1408_v27, %v1407_v21 }
 0x118   : > { %v1384_v28 = vpop.f32.mrf.mxu3  ;;  %v1258_v6 = vpop.f32.mrf.mxu0 }
 0x119   : > { %v1385_v50 = vadd.f32 %v1384_v28, %v1296_v30  ;;  %v1347_v56 = vpop.f32.mrf.mxu1  ;;  %1546 = vmatmul.bf16.gmra.mxu2 %v1434_v51  ;;  %v1259_v62 = vadd.f32 %v2744_v42, %v1258_v6  ;;  %v2814_v51 = vld [vmem:[%s3086_s6] ss:$0 sm:$0xff] }
 0x11b   : > { %v1424_v53 = vmax.f32 %v1385_v50, 0.0  ;;  %v1348_v63 = vadd.f32 %v1347_v56, %v1259_v62 }
 0x11d   : > { %v1442_v9 = vpack.c.bf16 %v1424_v53, %v1423_v15  ;;  %v1409_v5 = vmax.f32 %v1348_v63, 0.0 }
 0x11f   : > { %1586 = vmatmul.bf16.gmra.mxu3 %v1442_v9 }
 0x120   : > { %v1387_v32 = vpop.f32.mrf.mxu3  ;;  %v1260_v31 = vpop.f32.mrf.mxu0 }
 0x121   : > { %v1261_v17 = vadd.f32 %v2744_v42, %v1260_v31  ;;  %v1349_v18 = vpop.f32.mrf.mxu1  ;;  %v1388_v57 = vadd.f32 %v1387_v32, %v1299_v0 }
 0x123   : > { %v1350_v1 = vadd.f32 %v1349_v18, %v1261_v17  ;;  %v1425_v10 = vmax.f32 %v1388_v57, 0.0 }
 0x125   : > { %v1410_v41 = vmax.f32 %v1350_v1, 0.0 }
 0x127   : > { %v1435_v19 = vpack.c.bf16 %v1410_v41, %v1409_v5 }
 0x128   : > { %v1389_v7 = vpop.f32.mrf.mxu3  ;;  %v1263_v8 = vpop.f32.mrf.mxu0 }
 0x129   : > { %v1390_v58 = vadd.f32 %v1389_v7, %v1301_v3  ;;  %v1352_v12 = vpop.f32.mrf.mxu1  ;;  %1551 = vmatmul.bf16.gmra.mxu2 %v1435_v19  ;;  %v1264_v40 = vadd.f32 %v2744_v42, %v1263_v8 }
 0x12b   : > { %v1426_v61 = vmax.f32 %v1390_v58, 0.0  ;;  %v1353_v16 = vadd.f32 %v1352_v12, %v1264_v40 }
 0x12d   : > { %v1443_v13 = vpack.c.bf16 %v1426_v61, %v1425_v10  ;;  %v1411_v24 = vmax.f32 %v1353_v16, 0.0 }
 0x12f   : > { %1591 = vmatmul.bf16.gmra.mxu3 %v1443_v13 }
 0x130   : > { %v1392_v20 = vpop.f32.mrf.mxu3  ;;  %v1265_v2 = vpop.f32.mrf.mxu0 }
 0x131   : > { %v1266_v29 = vadd.f32 %v2744_v42, %v1265_v2  ;;  %v1354_v36 = vpop.f32.mrf.mxu1  ;;  %v1393_v26 = vadd.f32 %v1392_v20, %v1304_v43 }
 0x133   : > { %v1355_v22 = vadd.f32 %v1354_v36, %v1266_v29  ;;  %v1427_v14 = vmax.f32 %v1393_v26, 0.0 }
 0x135   : > { %v1412_v34 = vmax.f32 %v1355_v22, 0.0 }
 0x137   : > { %v1436_v38 = vpack.c.bf16 %v1412_v34, %v1411_v24 }
 0x138   : > { %v1394_v35 = vpop.f32.mrf.mxu3  ;;  %v1268_v39 = vpop.f32.mrf.mxu0 }
 0x139   : > { %v1395_v37 = vadd.f32 %v1394_v35, %v1306_v23  ;;  %v1357_v25 = vpop.f32.mrf.mxu1  ;;  %1556 = vmatmul.bf16.gmra.mxu2 %v1436_v38  ;;  %v1269_v33 = vadd.f32 %v2744_v42, %v1268_v39 }
 0x13b   : > { %v1428_v44 = vmax.f32 %v1395_v37, 0.0  ;;  %v1358_v46 = vadd.f32 %v1357_v25, %v1269_v33 }
 0x13d   : > { %v1444_v45 = vpack.c.bf16 %v1428_v44, %v1427_v14  ;;  %v1413_v4 = vmax.f32 %v1358_v46, 0.0 }
 0x13f   : > { %1596 = vmatmul.bf16.gmra.mxu3 %v1444_v45 }
 0x140   : > { %v1270_v52 = vpop.f32.mrf.mxu0 }
 0x141   : > { %v1271_v47 = vadd.f32 %v2744_v42, %v1270_v52  ;;  %v1359_v11 = vpop.f32.mrf.mxu1 }
 0x143   : > { %v1360_v55 = vadd.f32 %v1359_v11, %v1271_v47 }
 0x145   : > { %v1414_v54 = vmax.f32 %v1360_v55, 0.0 }
 0x147   : > { %v1437_v48 = vpack.c.bf16 %v1414_v54, %v1413_v4 }
 0x148   : > { %v1273_v30 = vpop.f32.mrf.mxu0 }
 0x149   : > { %v1362_v21 = vpop.f32.mrf.mxu1  ;;  %1561 = vmatmul.bf16.gmra.mxu2 %v1437_v48  ;;  %v1274_v28 = vadd.f32 %v2744_v42, %v1273_v30 }
 0x14b   : > { %v1363_v53 = vadd.f32 %v1362_v21, %v1274_v28 }
 0x14c   : > { %v1522_v27 = vpop.f32.mrf.mxu2 }
 0x14d   : > { %v1523_v50 = vadd.f32 %v2807_v49, %v1522_v27  ;;  %v1415_v31 = vmax.f32 %v1363_v53, 0.0 }
 0x14f   : > { %v1602_v6 = vmax.f32 %v1523_v50, 0.0 }
 0x150   : > { %v1275_v15 = vpop.f32.mrf.mxu0 }
 0x151   : > { %v1276_v56 = vadd.f32 %v2744_v42, %v1275_v15  ;;  %v1364_v59 = vpop.f32.mrf.mxu1  ;;  %v1638_v60 = vmul.f32 %v2814_v51, %v1602_v6 }
 0x153   : > { %v1365_v9 = vadd.f32 %v1364_v59, %v1276_v56  ;;  %v1671_v62 = vsel %vm1670_vm4, %v1638_v60, 0.0 }
 0x154   : > { %v1524_v32 = vpop.f32.mrf.mxu2  ;;  %1672 = vadd.xlane.f32.xlu0 %v1671_v62 }
 0x155   : > { %v1416_v63 = vmax.f32 %v1365_v9, 0.0  ;;  %v1525_v17 = vadd.f32 %v2807_v49, %v1524_v32 }
 0x157   : > { %v1603_v18 = vmax.f32 %v1525_v17, 0.0  ;;  %v1438_v0 = vpack.c.bf16 %v1416_v63, %v1415_v31 }
 0x158   : > { %v1278_v1 = vpop.f32.mrf.mxu0 }
 0x159   : > { %v1367_v3 = vpop.f32.mrf.mxu1  ;;  %1566 = vmatmul.bf16.gmra.mxu2 %v1438_v0  ;;  %v1639_v5 = vmul.f32 %v2814_v51, %v1603_v18  ;;  %v1279_v7 = vadd.f32 %v2744_v42, %v1278_v1 }
 0x15b   : > { %v1674_v57 = vsel %vm1670_vm4, %v1639_v5, 0.0  ;;  %v1368_v10 = vadd.f32 %v1367_v3, %v1279_v7 }
 0x15c   : > { %v1527_v41 = vpop.f32.mrf.mxu2  ;;  %1675 = vadd.xlane.f32.xlu0 %v1674_v57 }
 0x15d   : > { %v1528_v58 = vadd.f32 %v2807_v49, %v1527_v41  ;;  %v1417_v16 = vmax.f32 %v1368_v10, 0.0 }
 0x15f   : > { %v1604_v19 = vmax.f32 %v1528_v58, 0.0 }
 0x160   : > { %v1280_v8 = vpop.f32.mrf.mxu0 }
 0x161   : > { %v1281_v61 = vadd.f32 %v2744_v42, %v1280_v8  ;;  %v1369_v12 = vpop.f32.mrf.mxu1  ;;  %v1640_v13 = vmul.f32 %v2814_v51, %v1604_v19 }
 0x163   : > { %v1370_v40 = vadd.f32 %v1369_v12, %v1281_v61  ;;  %v1677_v20 = vsel %vm1670_vm4, %v1640_v13, 0.0 }
 0x164   : > { %v1529_v2 = vpop.f32.mrf.mxu2  ;;  %1678 = vadd.xlane.f32.xlu1 %v1677_v20 }
 0x165   : > { %v1418_v29 = vmax.f32 %v1370_v40, 0.0  ;;  %v1530_v36 = vadd.f32 %v2807_v49, %v1529_v2 }
 0x167   : > { %v1605_v43 = vmax.f32 %v1530_v36, 0.0  ;;  %v1439_v22 = vpack.c.bf16 %v1418_v29, %v1417_v16 }
 0x168   : > { %v1283_v23 = vpop.f32.mrf.mxu0 }
 0x169   : > { %v1372_v24 = vpop.f32.mrf.mxu1  ;;  %1571 = vmatmul.bf16.gmra.mxu2 %v1439_v22  ;;  %v1641_v26 = vmul.f32 %v2814_v51, %v1605_v43  ;;  %v1284_v37 = vadd.f32 %v2744_v42, %v1283_v23 }
 0x16b   : > { %v1680_v34 = vsel %vm1670_vm4, %v1641_v26, 0.0  ;;  %v1373_v44 = vadd.f32 %v1372_v24, %v1284_v37 }
 0x16c   : > { %v1532_v35 = vpop.f32.mrf.mxu2  ;;  %1681 = vadd.xlane.f32.xlu1 %v1680_v34 }
 0x16d   : > { %v1533_v38 = vadd.f32 %v2807_v49, %v1532_v35  ;;  %v1419_v11 = vmax.f32 %v1373_v44, 0.0 }
 0x16f   : > { %v1606_v39 = vmax.f32 %v1533_v38, 0.0 }
 0x170   : > { %v1285_v14 = vpop.f32.mrf.mxu0 }
 0x171   : > { %v1286_v25 = vadd.f32 %v2744_v42, %v1285_v14  ;;  %v1642_v45 = vmul.f32 %v2814_v51, %v1606_v39  ;;  %v1374_v33 = vpop.f32.mrf.mxu1 }
 0x173   : > { %v1375_v52 = vadd.f32 %v1374_v33, %v1286_v25  ;;  %v1683_v46 = vsel %vm1670_vm4, %v1642_v45, 0.0 }
 0x174   : > { %v1534_v47 = vpop.f32.mrf.mxu2  ;;  %1684 = vadd.xlane.f32.xlu2 %v1683_v46 }
 0x175   : > { %v1420_v55 = vmax.f32 %v1375_v52, 0.0  ;;  %v1535_v4 = vadd.f32 %v2807_v49, %v1534_v47 }
 0x177   : > { %v1607_v54 = vmax.f32 %v1535_v4, 0.0  ;;  %v1440_v48 = vpack.c.bf16 %v1420_v55, %v1419_v11 }
 0x179   : > { %1576 = vmatmul.bf16.gmra.mxu2 %v1440_v48  ;;  %v1643_v30 = vmul.f32 %v2814_v51, %v1607_v54 }
 0x17b   : > { %v1686_v21 = vsel %vm1670_vm4, %v1643_v30, 0.0 }
 0x17c   : > { %v1537_v42 = vpop.f32.mrf.mxu2  ;;  %1687 = vadd.xlane.f32.xlu2 %v1686_v21 }
 0x17d   : > { %v1538_v27 = vadd.f32 %v2807_v49, %v1537_v42 }
 0x17f   : > { %v1608_v28 = vmax.f32 %v1538_v27, 0.0 }
 0x181   : > { %v1644_v50 = vmul.f32 %v2814_v51, %v1608_v28 }
 0x183   : > { %v1689_v6 = vsel %vm1670_vm4, %v1644_v50, 0.0 }
 0x184   : > { %v1539_v15 = vpop.f32.mrf.mxu2  ;;  %1690 = vadd.xlane.f32.xlu0 %v1689_v6 }
 0x185   : > { %v1540_v53 = vadd.f32 %v2807_v49, %v1539_v15 }
 0x187   : > { %v1609_v56 = vmax.f32 %v1540_v53, 0.0 }
 0x189   : > { %v1645_v59 = vmul.f32 %v2814_v51, %v1609_v56 }
 0x18b   : > { %v1692_v60 = vsel %vm1670_vm4, %v1645_v59, 0.0 }
 0x18c   : > { %v1542_v9 = vpop.f32.mrf.mxu2  ;;  %1693 = vadd.xlane.f32.xlu1 %v1692_v60 }
 0x18d   : > { %v1543_v62 = vadd.f32 %v2807_v49, %v1542_v9 }
 0x18f   : > { %v1610_v32 = vmax.f32 %v1543_v62, 0.0 }
 0x191   : > { %v1646_v17 = vmul.f32 %v2814_v51, %v1610_v32 }
 0x192   : > { %v1582_v31 = vpop.f32.mrf.mxu3 }
 0x193   : > { %v1583_v63 = vadd.f32 %v2807_v49, %v1582_v31  ;;  %v1695_v0 = vsel %vm1670_vm4, %v1646_v17, 0.0 }
 0x194   : > { %v1544_v1 = vpop.f32.mrf.mxu2  ;;  %1696 = vadd.xlane.f32.xlu2 %v1695_v0 }
 0x195   : > { %v1626_v18 = vmax.f32 %v1583_v63, 0.0  ;;  %v1545_v3 = vadd.f32 %v2807_v49, %v1544_v1 }
 0x197   : > { %v1611_v5 = vmax.f32 %v1545_v3, 0.0  ;;  %v1662_v57 = vmul.f32 %v2814_v51, %v1626_v18 }
 0x199   : > { %v1647_v58 = vmul.f32 %v2814_v51, %v1611_v5  ;;  %v1743_v8 = vsel %vm1670_vm4, %v1662_v57, 0.0 }
 0x19a   : > { %v1584_v41 = vpop.f32.mrf.mxu3 }
 0x19b   : > { %v1585_v7 = vadd.f32 %v2807_v49, %v1584_v41  ;;  %v1698_v10 = vsel %vm1670_vm4, %v1647_v58, 0.0 }
 0x19c   : > { %v1547_v61 = vpop.f32.mrf.mxu2  ;;  %1744 = vadd.xlane.f32.xlu2 %v1743_v8  ;;  %1699 = vadd.xlane.f32.xlu0 %v1698_v10 }
 0x19d   : > { %v1627_v19 = vmax.f32 %v1585_v7, 0.0  ;;  %v1548_v12 = vadd.f32 %v2807_v49, %v1547_v61 }
 0x19f   : > { %v1612_v13 = vmax.f32 %v1548_v12, 0.0  ;;  %v1663_v40 = vmul.f32 %v2814_v51, %v1627_v19 }
 0x1a1   : > { %v1648_v16 = vmul.f32 %v2814_v51, %v1612_v13  ;;  %v1746_v43 = vsel %vm1670_vm4, %v1663_v40, 0.0 }
 0x1a2   : > { %v1587_v20 = vpop.f32.mrf.mxu3 }
 0x1a3   : > { %v1588_v2 = vadd.f32 %v2807_v49, %v1587_v20  ;;  %v1701_v36 = vsel %vm1670_vm4, %v1648_v16, 0.0 }
 0x1a4   : > { %v1549_v22 = vpop.f32.mrf.mxu2  ;;  %1702 = vadd.xlane.f32.xlu1 %v1701_v36  ;;  %1747 = vadd.xlane.f32.xlu0 %v1746_v43 }
 0x1a5   : > { %v1628_v29 = vmax.f32 %v1588_v2, 0.0  ;;  %v1550_v23 = vadd.f32 %v2807_v49, %v1549_v22 }
 0x1a7   : > { %v1664_v24 = vmul.f32 %v2814_v51, %v1628_v29  ;;  %v1613_v26 = vmax.f32 %v1550_v23, 0.0 }
 0x1a9   : > { %v1749_v34 = vsel %vm1670_vm4, %v1664_v24, 0.0  ;;  %v1649_v39 = vmul.f32 %v2814_v51, %v1613_v26 }
 0x1aa   : > { %v1589_v35 = vpop.f32.mrf.mxu3  ;;  %1750 = vadd.xlane.f32.xlu2 %v1749_v34 }
 0x1ab   : > { %v1590_v37 = vadd.f32 %v2807_v49, %v1589_v35  ;;  %v1704_v33 = vsel %vm1670_vm4, %v1649_v39, 0.0 }
 0x1ac   : > { %v1552_v14 = vpop.f32.mrf.mxu2 }
 0x1ad   : > { %v1629_v38 = vmax.f32 %v1590_v37, 0.0  ;;  %v1553_v44 = vadd.f32 %v2807_v49, %v1552_v14 }
 0x1af   : > { %v1665_v25 = vmul.f32 %v2814_v51, %v1629_v38  ;;  %v1614_v45 = vmax.f32 %v1553_v44, 0.0 }
 0x1b1   : > { %v1752_v52 = vsel %vm1670_vm4, %v1665_v25, 0.0  ;;  %v1650_v55 = vmul.f32 %v2814_v51, %v1614_v45 }
 0x1b2   : > { %v1592_v46 = vpop.f32.mrf.mxu3  ;;  %1705 = vadd.xlane.f32.xlu2 %v1704_v33  ;;  %1753 = vadd.xlane.f32.xlu0 %v1752_v52 }
 0x1b3   : > { %v1593_v47 = vadd.f32 %v2807_v49, %v1592_v46  ;;  %v1707_v42 = vsel %vm1670_vm4, %v1650_v55, 0.0 }
 0x1b4   : > { %v1554_v4 = vpop.f32.mrf.mxu2 }
 0x1b5   : > { %v1630_v11 = vmax.f32 %v1593_v47, 0.0  ;;  %v1555_v54 = vadd.f32 %v2807_v49, %v1554_v4 }
 0x1b7   : > { %v1666_v48 = vmul.f32 %v2814_v51, %v1630_v11  ;;  %v1615_v30 = vmax.f32 %v1555_v54, 0.0 }
 0x1b9   : > { %v1755_v21 = vsel %vm1670_vm4, %v1666_v48, 0.0  ;;  %v1651_v27 = vmul.f32 %v2814_v51, %v1615_v30 }
 0x1ba   : > { %1756 = vadd.xlane.f32.xlu2 %v1755_v21  ;;  %1708 = vadd.xlane.f32.xlu0 %v1707_v42  ;;  %v1594_v61 = vpop.f32.mrf.mxu3 }
 0x1bb   : > { %v1710_v28 = vsel %vm1670_vm4, %v1651_v27, 0.0  ;;  %v1595_v40 = vadd.f32 %v2807_v49, %v1594_v61 }
 0x1bc   : > { %v1557_v50 = vpop.f32.mrf.mxu2  ;;  %1711 = vadd.xlane.f32.xlu1 %v1710_v28 }
 0x1bd   : > { %v1558_v6 = vadd.f32 %v2807_v49, %v1557_v50  ;;  %v1631_v16 = vmax.f32 %v1595_v40, 0.0 }
 0x1bf   : > { %v1616_v15 = vmax.f32 %v1558_v6, 0.0  ;;  %v1667_v23 = vmul.f32 %v2814_v51, %v1631_v16 }
 0x1c1   : > { %v1652_v53 = vmul.f32 %v2814_v51, %v1616_v15  ;;  %v1758_v35 = vsel %vm1670_vm4, %v1667_v23, 0.0 }
 0x1c2   : > { %v1597_v26 = vpop.f32.mrf.mxu3 }
 0x1c3   : > { %v1713_v56 = vsel %vm1670_vm4, %v1652_v53, 0.0  ;;  %v1598_v27 = vadd.f32 %v2807_v49, %v1597_v26 }
 0x1c4   : > { %v1559_v59 = vpop.f32.mrf.mxu2  ;;  %1714 = vadd.xlane.f32.xlu2 %v1713_v56 }
 0x1c5   : > { %v1560_v60 = vadd.f32 %v2807_v49, %v1559_v59  ;;  %v1632_v56 = vmax.f32 %v1598_v27, 0.0 }
 0x1c7   : > { %v1617_v9 = vmax.f32 %v1560_v60, 0.0  ;;  %v2901_v38 = vpop.xlane.xlu0 %1672 }
 0x1c9   : > { %v1653_v62 = vmul.f32 %v2814_v51, %v1617_v9  ;;  %v2918_v9 = vpop.permute.xlu1 %1771 }
 0x1ca   : > { %v1599_v33 = vpop.f32.mrf.mxu3 }
 0x1cb   : > { %v1716_v32 = vsel %vm1670_vm4, %v1653_v62, 0.0  ;;  %v1600_v47 = vadd.f32 %v2807_v49, %v1599_v33 }
 0x1cc   : > { %v1562_v31 = vpop.f32.mrf.mxu2  ;;  %1717 = vadd.xlane.f32.xlu0 %v1716_v32  ;;  %v1668_v32 = vmul.f32 %v2814_v51, %v1632_v56 }
 0x1cd   : > { %v1563_v63 = vadd.f32 %v2807_v49, %v1562_v31  ;;  %v1633_v48 = vmax.f32 %v1600_v47, 0.0 }
 0x1cf   : > { %v1618_v17 = vmax.f32 %v1563_v63, 0.0  ;;  %v1676_v11 = vpop.xlane.xlu0 %1675  ;;  %v1669_v6 = vmul.f32 %v2814_v51, %v1633_v48  ;;  %v1761_v63 = vsel %vm1670_vm4, %v1668_v32, 0.0 }
 0x1d1   : > { %v1654_v18 = vmul.f32 %v2814_v51, %v1618_v17  ;;  %v1764_v59 = vsel %vm1670_vm4, %v1669_v6, 0.0 }
 0x1d3   : > { %v1719_v0 = vsel %vm1670_vm4, %v1654_v18, 0.0 }
 0x1d4   : > { %v1564_v1 = vpop.f32.mrf.mxu2  ;;  %1720 = vadd.xlane.f32.xlu1 %v1719_v0 }
 0x1d5   : > { %v1565_v3 = vadd.f32 %v2807_v49, %v1564_v1 }
 0x1d7   : > { %v1619_v5 = vmax.f32 %v1565_v3, 0.0  ;;  %v1679_v17 = vpop.xlane.xlu1 %1678 }
 0x1d9   : > { %v1655_v57 = vmul.f32 %v2814_v51, %v1619_v5 }
 0x1db   : > { %v1722_v41 = vsel %vm1670_vm4, %v1655_v57, 0.0 }
 0x1dc   : > { %v1567_v7 = vpop.f32.mrf.mxu2  ;;  %1723 = vadd.xlane.f32.xlu2 %v1722_v41 }
 0x1dd   : > { %v1568_v58 = vadd.f32 %v2807_v49, %v1567_v7 }
 0x1df   : > { %v1620_v19 = vmax.f32 %v1568_v58, 0.0  ;;  %v1682_v7 = vpop.xlane.xlu1 %1681 }
 0x1e1   : > { %v1656_v8 = vmul.f32 %v2814_v51, %v1620_v19 }
 0x1e3   : > { %v1725_v10 = vsel %vm1670_vm4, %v1656_v8, 0.0 }
 0x1e4   : > { %v1569_v12 = vpop.f32.mrf.mxu2  ;;  %1726 = vadd.xlane.f32.xlu0 %v1725_v10 }
 0x1e5   : > { %v1570_v13 = vadd.f32 %v2807_v49, %v1569_v12 }
 0x1e7   : > { %v1621_v20 = vmax.f32 %v1570_v13, 0.0  ;;  %v2904_v14 = vpop.xlane.xlu2 %1684 }
 0x1e8   : > { %v1778_v26 = vadd.f32 %v2918_v9, %v2904_v14 }
 0x1e9   : > { %v1657_v2 = vmul.f32 %v2814_v51, %v1621_v20 }
 0x1eb   : > { %v1728_v29 = vsel %vm1670_vm4, %v1657_v2, 0.0 }
 0x1ec   : > { %v1572_v36 = vpop.f32.mrf.mxu2  ;;  %1729 = vadd.xlane.f32.xlu1 %v1728_v29  ;;  %v1777_v29 = vadd.f32 %v2918_v9, %v1682_v7 }
 0x1ed   : > { %v1573_v43 = vadd.f32 %v2807_v49, %v1572_v36 }
 0x1ef   : > { %v1622_v22 = vmax.f32 %v1573_v43, 0.0  ;;  %v1688_v4 = vpop.xlane.xlu2 %1687  ;;  %v1775_v43 = vadd.f32 %v2918_v9, %v1676_v11 }
 0x1f0   : > { %v1779_v36 = vadd.f32 %v2918_v9, %v1688_v4 }
 0x1f1   : > { %v1658_v24 = vmul.f32 %v2814_v51, %v1622_v22  ;;  %v1776_v22 = vadd.f32 %v2918_v9, %v1679_v17 }
 0x1f3   : > { %v1731_v34 = vsel %vm1670_vm4, %v1658_v24, 0.0 }
 0x1f4   : > { %v1574_v37 = vpop.f32.mrf.mxu2  ;;  %1732 = vadd.xlane.f32.xlu2 %v1731_v34  ;;  %1759 = vadd.xlane.f32.xlu1 %v1758_v35 }
 0x1f5   : > { %v1575_v39 = vadd.f32 %v2807_v49, %v1574_v37  ;;  %v1774_v37 = vadd.f32 %v2918_v9, %v2901_v38 }
 0x1f7   : > { %v1623_v44 = vmax.f32 %v1575_v39, 0.0  ;;  %v1691_v28 = vpop.xlane.xlu0 %1690 }
 0x1f9   : > { %v1659_v25 = vmul.f32 %v2814_v51, %v1623_v44  ;;  %v1780_v44 = vadd.f32 %v2918_v9, %v1691_v28 }
 0x1fb   : > { %v1734_v45 = vsel %vm1670_vm4, %v1659_v25, 0.0 }
 0x1fc   : > { %v1577_v52 = vpop.f32.mrf.mxu2  ;;  %1735 = vadd.xlane.f32.xlu0 %v1734_v45 }
 0x1fd   : > { %v1578_v46 = vadd.f32 %v2807_v49, %v1577_v52 }
 0x1ff   : > { %v1624_v55 = vmax.f32 %v1578_v46, 0.0  ;;  %v1694_v61 = vpop.xlane.xlu1 %1693 }
 0x200   : > { %v1781_v23 = vadd.f32 %v2918_v9, %v1694_v61 }
 0x201   : > { %v1660_v54 = vmul.f32 %v2814_v51, %v1624_v55 }
 0x203   : > { %v1737_v30 = vsel %vm1670_vm4, %v1660_v54, 0.0 }
 0x204   : > { %v1579_v21 = vpop.f32.mrf.mxu2  ;;  %1738 = vadd.xlane.f32.xlu2 %v1737_v30 }
 0x205   : > { %v1580_v42 = vadd.f32 %v2807_v49, %v1579_v21  ;;  %v1838_v49 = vlaneseq }
 0x207   : > { %v1625_v50 = vmax.f32 %v1580_v42, 0.0  ;;  %v1697_v15 = vpop.xlane.xlu2 %1696  ;;  %v2922_v18 = vand.u32 127, %v1838_v49 }
 0x208   : > { %v1782_v33 = vadd.f32 %v2918_v9, %v1697_v15 }
 0x209   : > { %v1661_v53 = vmul.f32 %v2814_v51, %v1625_v50  ;;  %v2926_v3 = vadd.s32 4294967288, %v2922_v18  ;;  %v1845_v46 = vperm.slane %v1776_v22, %v2922_v18  ;;  %v1848_v11 = vperm.slane %v1778_v26, %v2922_v18 }
 0x20a   : > { %v1840_v48 = vperm.slane %v1774_v37, %v2922_v18  ;;  %v1851_v21 = vperm.slane %v1780_v44, %v2922_v18  ;;  %v1854_v28 = vperm.slane %v1782_v33, %v2922_v18 }
 0x20b   : > { %v1740_v60 = vsel %vm1670_vm4, %v1661_v53, 0.0  ;;  %v1846_v39 = vperm.slane %v1777_v29, %v2926_v3  ;;  %v1849_v45 = vperm.slane %v1779_v36, %v2926_v3  ;;  %v1842_v14 = vperm.slane %v1775_v43, %v2926_v3 }
 0x20c   : > { %1765 = vadd.xlane.f32.xlu2 %v1764_v59  ;;  %1741 = vadd.xlane.f32.xlu0 %v1740_v60  ;;  %v1852_v47 = vperm.slane %v1781_v23, %v2926_v3 }
 0x20d   : > { %v1847_v30 = vsel %vm1843_vm5, %v1846_v39, %v1845_v46  ;;  %v1850_v27 = vsel %vm1843_vm5, %v1849_v45, %v1848_v11  ;;  %v1844_v6 = vsel %vm1843_vm5, %v1842_v14, %v1840_v48 }
 0x20e   : > { %v1853_v15 = vsel %vm1843_vm5, %v1852_v47, %v1851_v21  ;;  %v1890_v59 = vsel %vm418_vm2, %v1847_v30, %v1844_v6 }
 0x20f   : > { %v1700_v62 = vpop.xlane.xlu0 %1699  ;;  %v1745_v31 = vpop.xlane.xlu2 %1744  ;;  %v1891_v49 = vsel %vm422_vm1, %v1850_v27, %v1890_v59 }
 0x210   : > { %v1798_v0 = vadd.f32 %v2918_v9, %v1745_v31  ;;  %v1783_v34 = vadd.f32 %v2918_v9, %v1700_v62  ;;  %v1892_v17 = vsel %vm426_vm3, %v1853_v15, %v1891_v49 }
 0x212   : > { %v1878_v57 = vperm.slane %v1798_v0, %v2922_v18  ;;  %v1855_v55 = vperm.slane %v1783_v34, %v2926_v3 }
 0x214   : > { %1762 = vadd.xlane.f32.xlu0 %v1761_v63  ;;  %v1856_v60 = vsel %vm1843_vm5, %v1855_v55, %v1854_v28 }
 0x217   : > { %v1748_v1 = vpop.xlane.xlu0 %1747  ;;  %v1703_v2 = vpop.xlane.xlu1 %1702 }
 0x218   : > { %v1799_v5 = vadd.f32 %v2918_v9, %v1748_v1  ;;  %v1784_v38 = vadd.f32 %v2918_v9, %v1703_v2  ;;  %v1894_v1 = vsel %vm1893_vm6, %v1856_v60, %v1892_v17 }
 0x21a   : > { %v1879_v51 = vperm.slane %v1799_v5, %v2926_v3  ;;  %v1857_v53 = vperm.slane %v1784_v38, %v2922_v18 }
 0x21c   : > { %v2932_v41 = vsel %vm1843_vm5, %v1879_v51, %v1878_v57 }
 0x21d   : > { %v1751_v58 = vpop.xlane.xlu2 %1750 }
 0x21e   : > { %v1800_v19 = vadd.f32 %v2918_v9, %v1751_v58 }
 0x220   : > { %v1881_v12 = vperm.slane %v1800_v19, %v2922_v18 }
 0x225   : > { %v1754_v8 = vpop.xlane.xlu0 %1753  ;;  %v1706_v20 = vpop.xlane.xlu2 %1705 }
 0x226   : > { %v1801_v10 = vadd.f32 %v2918_v9, %v1754_v8  ;;  %v1785_v25 = vadd.f32 %v2918_v9, %v1706_v20 }
 0x228   : > { %v1882_v13 = vperm.slane %v1801_v10, %v2926_v3  ;;  %v1858_v42 = vperm.slane %v1785_v25, %v2926_v3 }
 0x22a   : > { %v2939_v40 = vsel %vm1843_vm5, %v1882_v13, %v1881_v12  ;;  %v1859_v31 = vsel %vm1843_vm5, %v1858_v42, %v1857_v53 }
 0x22b   : > { %v1896_v51 = vsel %vm1895_vm7, %v1859_v31, %v1894_v1 }
 0x22d   : > { %v2941_v16 = vpop.xlane.xlu2 %1756  ;;  %v1709_v35 = vpop.xlane.xlu0 %1708 }
 0x22e   : > { %v1786_v4 = vadd.f32 %v2918_v9, %v1709_v35  ;;  %v1802_v47 = vadd.f32 %v2918_v9, %v2941_v16 }
 0x22f   : > { %v1712_v24 = vpop.xlane.xlu1 %1711 }
 0x230   : > { %v1787_v52 = vadd.f32 %v2918_v9, %v1712_v24  ;;  %v1860_v62 = vperm.slane %v1786_v4, %v2922_v18  ;;  %v1884_v16 = vperm.slane %v1802_v47, %v2922_v18 }
 0x232   : > { %v1861_v50 = vperm.slane %v1787_v52, %v2926_v3 }
 0x234   : > { %v1862_v0 = vsel %vm1843_vm5, %v1861_v50, %v1860_v62 }
 0x235   : > { %v1898_v7 = vsel %vm1897_vm8, %v1862_v0, %v1896_v51 }
 0x237   : > { %v1715_v54 = vpop.xlane.xlu2 %1714 }
 0x238   : > { %v1788_v56 = vadd.f32 %v2918_v9, %v1715_v54 }
 0x23a   : > { %v1863_v5 = vperm.slane %v1788_v56, %v2922_v18 }
 0x23f   : > { %v1718_v32 = vpop.xlane.xlu0 %1717 }
 0x240   : > { %v1789_v63 = vadd.f32 %v2918_v9, %v1718_v32 }
 0x242   : > { %v1864_v57 = vperm.slane %v1789_v63, %v2926_v3 }
 0x244   : > { %v1865_v58 = vsel %vm1843_vm5, %v1864_v57, %v1863_v5 }
 0x245   : > { %v1900_v19 = vsel %vm1899_vm9, %v1865_v58, %v1898_v7 }
 0x246   : > { %1911 = vst.msk [vmem:[%s2995_s20] sm:$0xff] %vm1910_vm10, %v1900_v19 }
 0x247   : > { %v1721_v10 = vpop.xlane.xlu1 %1720 }
 0x248   : > { %v1790_v24 = vadd.f32 %v2918_v9, %v1721_v10 }
 0x24a   : > { %v1866_v52 = vperm.slane %v1790_v24, %v2922_v18 }
 0x24f   : > { %v1724_v8 = vpop.xlane.xlu2 %1723 }
 0x250   : > { %v1791_v43 = vadd.f32 %v2918_v9, %v1724_v8 }
 0x252   : > { %v1867_v37 = vperm.slane %v1791_v43, %v2926_v3 }
 0x254   : > { %v1868_v11 = vsel %vm1843_vm5, %v1867_v37, %v1866_v52 }
 0x257   : > { %v1727_v61 = vpop.xlane.xlu0 %1726 }
 0x258   : > { %v1792_v22 = vadd.f32 %v2918_v9, %v1727_v61 }
 0x25a   : > { %v1869_v39 = vperm.slane %v1792_v22, %v2922_v18 }
 0x25f   : > { %v1730_v13 = vpop.xlane.xlu1 %1729 }
 0x260   : > { %v1793_v2 = vadd.f32 %v2918_v9, %v1730_v13 }
 0x262   : > { %v1870_v26 = vperm.slane %v1793_v2, %v2926_v3 }
 0x264   : > { %v1871_v14 = vsel %vm1843_vm5, %v1870_v26, %v1869_v39 }
 0x265   : > { %v1901_v54 = vsel %vm418_vm2, %v1871_v14, %v1868_v11 }
 0x267   : > { %v1733_v12 = vpop.xlane.xlu2 %1732  ;;  %v1760_v34 = vpop.xlane.xlu1 %1759 }
 0x268   : > { %v1794_v23 = vadd.f32 %v2918_v9, %v1733_v12  ;;  %v1803_v45 = vadd.f32 %v2918_v9, %v1760_v34 }
 0x26a   : > { %v1872_v25 = vperm.slane %v1794_v23, %v2922_v18  ;;  %v1885_v48 = vperm.slane %v1803_v45, %v2926_v3 }
 0x26c   : > { %v1886_v6 = vsel %vm1843_vm5, %v1885_v48, %v1884_v16 }
 0x26f   : > { %v1736_v20 = vpop.xlane.xlu0 %1735 }
 0x270   : > { %v1795_v29 = vadd.f32 %v2918_v9, %v1736_v20 }
 0x272   : > { %v1873_v35 = vperm.slane %v1795_v29, %v2926_v3 }
 0x274   : > { %v1874_v38 = vsel %vm1843_vm5, %v1873_v35, %v1872_v25 }
 0x275   : > { %v1902_v21 = vsel %vm422_vm1, %v1874_v38, %v1901_v54 }
 0x277   : > { %v1739_v36 = vpop.xlane.xlu2 %1738 }
 0x278   : > { %v1796_v44 = vadd.f32 %v2918_v9, %v1739_v36 }
 0x27a   : > { %v1875_v55 = vperm.slane %v1796_v44, %v2922_v18 }
 0x27f   : > { %v1742_v33 = vpop.xlane.xlu0 %1741  ;;  %v1766_v30 = vpop.xlane.xlu2 %1765 }
 0x280   : > { %v1797_v46 = vadd.f32 %v2918_v9, %v1742_v33  ;;  %v1805_v28 = vadd.f32 %v2918_v9, %v1766_v30 }
 0x282   : > { %v1876_v4 = vperm.slane %v1797_v46, %v2926_v3  ;;  %v1888_v60 = vperm.slane %v1805_v28, %v2926_v3 }
 0x284   : > { %v1877_v42 = vsel %vm1843_vm5, %v1876_v4, %v1875_v55 }
 0x285   : > { %v1903_v27 = vsel %vm426_vm3, %v1877_v42, %v1902_v21 }
 0x286   : > { %v1904_v50 = vsel %vm1893_vm6, %v2932_v41, %v1903_v27 }
 0x287   : > { %v1905_v15 = vsel %vm1895_vm7, %v2939_v40, %v1904_v50  ;;  %v1763_v53 = vpop.xlane.xlu0 %1762 }
 0x288   : > { %v1906_v56 = vsel %vm1897_vm8, %v1886_v6, %v1905_v15  ;;  %v1804_v59 = vadd.f32 %v2918_v9, %v1763_v53 }
 0x28a   : > { %v1887_v62 = vperm.slane %v1804_v59, %v2922_v18 }
 0x28c   : > { %v1889_v41 = vsel %vm1843_vm5, %v1888_v60, %v1887_v62 }
 0x28d   : > { %v1907_v32 = vsel %vm1899_vm9, %v1889_v41, %v1906_v56 }
 0x28e   : > { %1912 = vst.msk [vmem:[%s2995_s20 + $0x8] sm:$0xff] %vm1910_vm10, %v1907_v32 }
 0x28f   : > { %2357 = shalt.err (!%p2354_p9)
}
 0x290   : > { %s2418_s15 = smov 128   ;;  %s2419_s20 = smov 8  }
 0x291   : > { %2227 = dma.vmem_to_hbm [thread:$0]  (%p2508_p4), %s1930_s10, 256, %s1932_s25, %s1914_s26, %s2418_s15, %s2418_s15, %s2419_s20  }
 0x292 PF: > { %p2239_p10 = scmp.ge.s32.totalorder %s2412_s12, 2  ;;  %s1946_s23 = sand.u32 1, %s2392_s29  }
 0x293   : > { %s1947_s24 = scalar_lea.sflag [#allocation5], %s1946_s23 }
 0x294   : > { %p2234_p11 = pnand %p2239_p10, %p2515_p8 }
 0x296   : > { %p2235_p12 = pneg %p2234_p11 }
 0x298   : > { %2387 = dma.done.wait (%p2235_p12), %s1947_s24, 256  }
 0x299   : > { %2389 = vsyncadd (%p2235_p12), %s1947_s24, 4294967040  ;;  %s24_s12 = sadd.s32 1, %s2412_s12   ;;  %s3091_s29 = smov %s2396_s30 }
 0x29a   : > { %p21_p13 = scmp.ge.s32.totalorder %s24_s12, 4   ;;  %s3092_s30 = smov %s2400_s9 }
 0x29b   : > { %s3093_s9 = smov %s2521_s19  ;;  %s3094_s10 = smov %s2408_s11 }
 0x29c   : > { %s3095_s11 = smov %s3097_s14  ;;  %23 = sbr.rel (!%p21_p13) target bundleno = 8 (0x8), region = 95 }
 0x2a1   :  { %1953 = vsyncpa [#allocation4], 1 }
 0x2a2   :  { %1955 = vsyncpa [#allocation4 + $0x1], 1 }
 0x2a3   :  { %1956 = vsyncpa [#allocation5], 1 }
 0x2a4   :  { %1958 = vsyncpa [#allocation5 + $0x1], 1 }

</bundles_post_ra>
